<compile_context>
chip_gen: v7x
topology: tpu7x:2x2x1
jax: 0.10.0
libtpu: 0.0.40
codegen_flags: <defaults>
</compile_context>

<pallas_src>
import jax
import jax.numpy as jnp
from jax.experimental import pallas as pl
from jax.experimental.pallas import tpu as pltpu


# ----------------------------------------------------------------------------
# Tiling heuristics
# ----------------------------------------------------------------------------
def _vmem_limit_bytes():
    """Generation-dispatched scoped-VMEM limit.

    v5e/v6e have 128 MiB physical VMEM, v7x only 64 MiB; leave headroom for
    double-buffered input blocks.
    """
    try:
        kind = jax.devices()[0].device_kind.lower()
    except Exception:  # pragma: no cover - defensive
        kind = ""
    if "v5" in kind:
        return 64 * 1024 * 1024
    if "v6" in kind:
        return 96 * 1024 * 1024
    return 32 * 1024 * 1024        # v7x (and unknown): conservative


def _pick_batch_block(B, N):
    """Batch rows per grid step.  Target M = Bb*N ~128-256, sublane aligned;
    prefer leaving B//Bb >= 2 so ("parallel", ...) can shard across v7x's two
    TensorCores when that still fills the MXU M dimension."""
    divs = [d for d in range(1, B + 1) if B % d == 0]
    fitting = [d for d in divs if d * N <= 256] or [1]
    aligned = [d for d in fitting if (d * N) % 8 == 0] or fitting
    megacore = [d for d in aligned if d * N >= 128 and B // d >= 2]
    if megacore:
        return min(megacore)
    return max(aligned)


def _pick_time_block(T, step_bytes, target_bytes=512 * 1024, max_unroll=16):
    """Time steps per grid iteration (statically unrolled in-kernel).

    Returns (Tb, Tpad).  Guards against degenerate divisor picks (e.g. prime
    T): pads the time axis to a composite length; tail steps are masked
    inside the kernel."""
    divs = [d for d in range(1, T + 1) if T % d == 0]
    fitting = [d for d in divs
               if d <= max_unroll and d * step_bytes <= target_bytes]
    Tb = max(fitting) if fitting else 1
    if Tb < min(T, 4):          # degenerate -> pad instead of Tb=1
        Tb = min(T, 8)
    Tpad = -(-T // Tb) * Tb
    return Tb, Tpad


# ----------------------------------------------------------------------------
# Fused TGCN kernel: SAGE encoder + TGCNCell GRU recurrence + emb2y head.
#   grid = (B // Bb, Tpad // Tb)   semantics ("parallel", "arbitrary")
#   x block       : (Bb, Tb, N, d_in) f32, read straight from tx_org
#   hidden state  : VMEM scratch (Bb*N, D) f32, never written to HBM
#   output        : (Bb*N, 128)-padded head logits, written at last t block
#
# NOTE(correctness): the hidden-state carry in h_scr relies on the t grid
# axis being the innermost axis and marked "arbitrary" (sequential), with the
# reset keyed on t_blk == 0.  Do not reorder the grid or mark t "parallel".
# ----------------------------------------------------------------------------
def _make_tgcn_kernel(num_layers, Bb, Tb, N, d_in, D, T_real):
    G = Bb * Tb          # graphs (b, t pairs) encoded per grid step
    M = Bb * N           # GRU rows (batch*node) per grid step

    def kernel(x_ref, *refs):
        sage_refs = refs[:3 * num_layers]
        (wx_ref, whzr_ref, whh_ref, b3_ref,
         whead_ref, bhead_ref, y_ref, h_scr) = refs[3 * num_layers:]

        t_blk = pl.program_id(1)

        @pl.when(t_blk == 0)
        def _():
            h_scr[...] = jnp.zeros_like(h_scr)

        # ---- fused SAGE-style encoder on the whole (Bb, Tb) block --------
        #   per layer: h <- relu( h @ Ws + mean_nodes(h) @ Wn + b )
        h_enc = x_ref[...].reshape(G, N, d_in)            # (G, N, d_in) f32
        for l in range(num_layers):
            ws = sage_refs[3 * l][...]                    # (d, e) bf16
            wn = sage_refs[3 * l + 1][...]                # (d, e) bf16
            b = sage_refs[3 * l + 2][...]                 # (1, e) f32
            d = h_enc.shape[-1]
            e = ws.shape[-1]
            mean = jnp.mean(h_enc.astype(jnp.float32), axis=1)     # (G, d)
            y_self = jnp.dot(
                h_enc.reshape(G * N, d).astype(jnp.bfloat16), ws,
                preferred_element_type=jnp.float32).reshape(G, N, e)
            y_nb = jnp.dot(mean.astype(jnp.bfloat16), wn,
                           preferred_element_type=jnp.float32)     # (G, e)
            # bf16 inter-layer activations (f32 accumulation already done).
            h_enc = jnp.maximum(y_self + y_nb[:, None, :] + b[None],
                                0.0).astype(jnp.bfloat16)

        # ---- hoisted x-side GRU matmul for the full time block -----------
        # One (G*N, D) @ (D, 3D) matmul instead of Tb tiny matmuls on the
        # serial chain; split into z/r/h chunks once per block.
        s_all = (jnp.dot(h_enc.reshape(G * N, D), wx_ref[...],
                         preferred_element_type=jnp.float32)
                 + b3_ref[...]).reshape(Bb, Tb, N, 3 * D)
        sz_all = s_all[..., :D]                           # (Bb, Tb, N, D)
        sr_all = s_all[..., D:2 * D]
        sh_all = s_all[..., 2 * D:]

        whzr = whzr_ref[...]                              # (D, 2D) bf16
        whh = whh_ref[...]                                # (D, D)  bf16
        h = h_scr[...]                                    # (M, D)  f32

        for ti in range(Tb):                              # unrolled recurrence
            hzr = jnp.dot(h.astype(jnp.bfloat16), whzr,
                          preferred_element_type=jnp.float32)      # (M, 2D)
            z = jax.nn.sigmoid(sz_all[:, ti].reshape(M, D) + hzr[:, :D])
            r = jax.nn.sigmoid(sr_all[:, ti].reshape(M, D) + hzr[:, D:])
            h_tilde = jnp.tanh(
                sh_all[:, ti].reshape(M, D) +
                jnp.dot((r * h).astype(jnp.bfloat16), whh,
                        preferred_element_type=jnp.float32))
            # Reference calls relu(hidden_state) but discards the result, so
            # no activation is applied to the carried hidden state.
            h_new = z * h + (1.0 - z) * h_tilde
            if T_real % Tb != 0:
                # Time axis was padded; freeze h on the padded tail steps.
                valid = (t_blk * Tb + ti) < T_real
                h_new = jnp.where(valid, h_new, h)
            h = h_new

        h_scr[...] = h

        @pl.when(t_blk == pl.num_programs(1) - 1)
        def _():
            # Fused emb2y head; output width pre-padded to 128 lanes
            # (lane-dense stores), sliced back in the wrapper.
            y_ref[...] = (jnp.dot(h.astype(jnp.bfloat16), whead_ref[...],
                                  preferred_element_type=jnp.float32)
                          + bhead_ref[...])

    return kernel


def tgcn_pallas(tx, params):
    """tx: (B, T, N, d_in) -> (B*N, LTpad) f32 head logits via one kernel."""
    B, T, N, d_in = tx.shape
    D = params["gru"]["whh"].shape[0]
    LTp = params["emb2y"]["w"].shape[1]
    num_layers = len(params["sage"])

    Bb = _pick_batch_block(B, N)
    Tb, Tpad = _pick_time_block(T, step_bytes=Bb * N * d_in * 4)
    M = Bb * N

    x = tx.astype(jnp.float32)
    if Tpad != T:
        x = jnp.pad(x, ((0, 0), (0, Tpad - T), (0, 0), (0, 0)))

    in_specs = [pl.BlockSpec((Bb, Tb, N, d_in), lambda b, t: (b, t, 0, 0))]
    flat_w = []
    for layer in params["sage"]:
        di, do = layer["w_self"].shape
        in_specs += [
            pl.BlockSpec((di, do), lambda b, t: (0, 0)),
            pl.BlockSpec((di, do), lambda b, t: (0, 0)),
            pl.BlockSpec((1, do), lambda b, t: (0, 0)),
        ]
        flat_w += [layer["w_self"], layer["w_neigh"], layer["b"]]

    gru, head = params["gru"], params["emb2y"]
    in_specs += [
        pl.BlockSpec((D, 3 * D), lambda b, t: (0, 0)),
        pl.BlockSpec((D, 2 * D), lambda b, t: (0, 0)),
        pl.BlockSpec((D, D), lambda b, t: (0, 0)),
        pl.BlockSpec((1, 3 * D), lambda b, t: (0, 0)),
        pl.BlockSpec((D, LTp), lambda b, t: (0, 0)),
        pl.BlockSpec((1, LTp), lambda b, t: (0, 0)),
    ]
    flat_w += [gru["wx"], gru["whzr"], gru["whh"], gru["b3"],
               head["w"], head["b"]]

    return pl.pallas_call(
        _make_tgcn_kernel(num_layers, Bb, Tb, N, d_in, D, T),
        out_shape=jax.ShapeDtypeStruct((B * N, LTp), jnp.float32),
        grid_spec=pltpu.PrefetchScalarGridSpec(
            num_scalar_prefetch=0,
            grid=(B // Bb, Tpad // Tb),
            in_specs=in_specs,
            out_specs=pl.BlockSpec((M, LTp), lambda b, t: (b, 0)),
            scratch_shapes=[pltpu.VMEM((M, D), jnp.float32)],
        ),
        compiler_params=pltpu.CompilerParams(
            dimension_semantics=("parallel", "arbitrary"),
            vmem_limit_bytes=_vmem_limit_bytes()),
    )(x, *flat_w)


# ----------------------------------------------------------------------------
# Parameter init (deterministic, PyTorch-Linear-style uniform(-1/sqrt(fan_in)))
# Matmul weights stored in bf16 (f32 accumulation in-kernel), biases f32.
# ----------------------------------------------------------------------------
def init_params(key, input_dim, hidden_dims, len_test):
    D = hidden_dims[-1]
    keys = iter(jax.random.split(key, 64))

    def u(shape, fan_in):
        bound = 1.0 / (fan_in ** 0.5)
        return jax.random.uniform(next(keys), shape, jnp.float32, -bound, bound)

    sage = []
    d_in = input_dim
    for d_out in hidden_dims:
        sage.append({
            "w_self": u((d_in, d_out), d_in).astype(jnp.bfloat16),
            "w_neigh": u((d_in, d_out), d_in).astype(jnp.bfloat16),
            "b": u((1, d_out), d_in),
        })
        d_in = d_out

    # GRU: each gate is Linear(input_dim + out_dim -> out_dim) over cat[x, h];
    # fan_in = 2*D.  x-side weights packed as (D, 3D) [z|r|h], h-side z/r
    # weights as (D, 2D); h_tilde's h-side (applied to r*h) stays separate.
    fan = 2 * D
    gru = {
        "wx": jnp.concatenate([u((D, D), fan) for _ in range(3)],
                              axis=1).astype(jnp.bfloat16),
        "whzr": jnp.concatenate([u((D, D), fan) for _ in range(2)],
                                axis=1).astype(jnp.bfloat16),
        "whh": u((D, D), fan).astype(jnp.bfloat16),
        "b3": jnp.concatenate([u((1, D), fan) for _ in range(3)], axis=1),
    }

    # emb2y head, zero-padded to a lane-dense (multiple of 128) output width.
    LTp = ((len_test + 127) // 128) * 128
    w_head = jnp.zeros((D, LTp), jnp.float32).at[:, :len_test].set(
        u((D, len_test), D))
    b_head = jnp.zeros((1, LTp), jnp.float32).at[:, :len_test].set(
        u((1, len_test), D))
    emb2y = {"w": w_head.astype(jnp.bfloat16), "b": b_head}

    return {"sage": sage, "gru": gru, "emb2y": emb2y, "len_test": len_test}


# ----------------------------------------------------------------------------
# Full TGCN forward
# ----------------------------------------------------------------------------
def tgcn_forward(tx, params):
    B, T, N, _ = tx.shape
    LT = params["len_test"]

    y = tgcn_pallas(tx, params)                          # (B*N, LTpad) f32

    # Slice off lane padding; permute(0, 2, 1).unsqueeze(-1) as in reference.
    logits = y[:, :LT].reshape(B, N, LT)                 # (B, N, len_test)
    logits = jnp.transpose(logits, (0, 2, 1))[..., None]  # (B, len_test, N, 1)
    return logits


if __name__ == "__main__":
    # Small shapes consistent with the module:
    B, T_train, N = 2, 8, 16          # batch, time_train_len, num_node
    input_dim = 4
    hidden_dim = [32]                 # out_dim = hidden_dim[-1] = 32
    len_test = 8

    key = jax.random.PRNGKey(0)
    k_x, k_p = jax.random.split(key)
    tx_org = jax.random.normal(k_x, (B, T_train, N, input_dim),
                               dtype=jnp.float32)
    params = init_params(k_p, input_dim, hidden_dim, len_test)

    out = tgcn_forward(tx_org, params)
    out = jax.block_until_ready(out)
    assert out.shape == (B, len_test, N, 1), out.shape
    assert bool(jnp.all(jnp.isfinite(out)))
    print("KERNEL_OK")
</pallas_src>

<mosaic_0001>
module attributes {stable_mosaic.version = 11 : i64} {
  func.func @kernel(%arg0: i32, %arg1: i32, %arg2: memref<2x8x16x4xf32, #tpu.memory_space<vmem>>, %arg3: memref<4x32xbf16, #tpu.memory_space<vmem>>, %arg4: memref<4x32xbf16, #tpu.memory_space<vmem>>, %arg5: memref<1x32xf32, #tpu.memory_space<vmem>>, %arg6: memref<32x96xbf16, #tpu.memory_space<vmem>>, %arg7: memref<32x64xbf16, #tpu.memory_space<vmem>>, %arg8: memref<32x32xbf16, #tpu.memory_space<vmem>>, %arg9: memref<1x96xf32, #tpu.memory_space<vmem>>, %arg10: memref<32x128xbf16, #tpu.memory_space<vmem>>, %arg11: memref<1x128xf32, #tpu.memory_space<vmem>>, %arg12: memref<32x128xf32, #tpu.memory_space<vmem>>, %arg13: memref<32x32xf32, #tpu.memory_space<vmem>>) attributes {dimension_semantics = [#tpu.dimension_semantics<parallel>, #tpu.dimension_semantics<arbitrary>], iteration_bounds = array<i64: 1, 1>, scalar_prefetch = 0 : i64, scratch_operands = 1 : i64, tpu.core_type = #tpu.core_type<tc>, window_params = [{transform_indices = @transform_0, window_bounds = array<i64: 2, 8, 16, 4>}, {pipeline_mode = #tpu.pipeline_mode<synchronous>, transform_indices = @transform_1, window_bounds = array<i64: 4, 32>}, {pipeline_mode = #tpu.pipeline_mode<synchronous>, transform_indices = @transform_2, window_bounds = array<i64: 4, 32>}, {pipeline_mode = #tpu.pipeline_mode<synchronous>, transform_indices = @transform_3, window_bounds = array<i64: 1, 32>}, {pipeline_mode = #tpu.pipeline_mode<synchronous>, transform_indices = @transform_4, window_bounds = array<i64: 32, 96>}, {pipeline_mode = #tpu.pipeline_mode<synchronous>, transform_indices = @transform_5, window_bounds = array<i64: 32, 64>}, {pipeline_mode = #tpu.pipeline_mode<synchronous>, transform_indices = @transform_6, window_bounds = array<i64: 32, 32>}, {pipeline_mode = #tpu.pipeline_mode<synchronous>, transform_indices = @transform_7, window_bounds = array<i64: 1, 96>}, {pipeline_mode = #tpu.pipeline_mode<synchronous>, transform_indices = @transform_8, window_bounds = array<i64: 32, 128>}, {pipeline_mode = #tpu.pipeline_mode<synchronous>, transform_indices = @transform_9, window_bounds = array<i64: 1, 128>}, {transform_indices = @transform_10, window_bounds = array<i64: 32, 128>}]} {
    %c0_i32 = arith.constant 0 : i32
    %0 = arith.cmpi eq, %arg1, %c0_i32 : i32
    %1 = arith.extui %0 : i1 to i32
    %c0_i32_0 = arith.constant 0 : i32
    %2 = arith.cmpi ne, %1, %c0_i32_0 : i32
    scf.if %2 {
      %cst_69 = arith.constant 0.000000e+00 : f32
      %323 = vector.broadcast %cst_69 : f32 to vector<32x32xf32>
      %c0_70 = arith.constant 0 : index
      %c0_71 = arith.constant 0 : index
      %324 = vector.load %arg13[%c0_70, %c0_71] : memref<32x32xf32, #tpu.memory_space<vmem>>, vector<32x32xf32>
      tpu.vector_store %arg13[%c0_70, %c0_71], %323 {strides = array<i32>} : memref<32x32xf32, #tpu.memory_space<vmem>>, vector<32x32xf32>,
    } else {
    }
    %c0 = arith.constant 0 : index
    %c0_1 = arith.constant 0 : index
    %c0_2 = arith.constant 0 : index
    %c0_3 = arith.constant 0 : index
    %3 = vector.load %arg2[%c0, %c0_1, %c0_2, %c0_3] : memref<2x8x16x4xf32, #tpu.memory_space<vmem>>, vector<2x8x16x4xf32>
    %4 = vector.shape_cast %3 : vector<2x8x16x4xf32> to vector<16x16x4xf32>
    %c0_4 = arith.constant 0 : index
    %c0_5 = arith.constant 0 : index
    %5 = vector.load %arg3[%c0_4, %c0_5] : memref<4x32xbf16, #tpu.memory_space<vmem>>, vector<4x32xbf16>
    %c0_6 = arith.constant 0 : index
    %c0_7 = arith.constant 0 : index
    %6 = vector.load %arg4[%c0_6, %c0_7] : memref<4x32xbf16, #tpu.memory_space<vmem>>, vector<4x32xbf16>
    %c0_8 = arith.constant 0 : index
    %c0_9 = arith.constant 0 : index
    %7 = vector.load %arg5[%c0_8, %c0_9] : memref<1x32xf32, #tpu.memory_space<vmem>>, vector<1x32xf32>
    %cst = arith.constant dense<0.000000e+00> : vector<16x4xf32>
    %8 = vector.multi_reduction <add>, %4, %cst [1] : vector<16x16x4xf32> to vector<16x4xf32>
    %cst_10 = arith.constant 1.600000e+01 : f32
    %9 = vector.broadcast %cst_10 : f32 to vector<16x4xf32>
    %10 = arith.divf %8, %9 : vector<16x4xf32>
    %11 = vector.shape_cast %4 : vector<16x16x4xf32> to vector<256x4xf32>
    %12 = arith.truncf %11 : vector<256x4xf32> to vector<256x4xbf16>
    %cst_11 = arith.constant dense<0.000000e+00> : vector<256x32xf32>
    %13 = tpu.matmul %12, %5, %cst_11 {dimension_numbers = #tpu.dot_dimension_numbers<[1], [0], [0], [1], [0, 0, 1, 1], [], []>} : vector<256x4xbf16>, vector<4x32xbf16>, vector<256x32xf32> -> vector<256x32xf32>
    %14 = vector.shape_cast %13 : vector<256x32xf32> to vector<16x16x32xf32>
    %15 = arith.truncf %10 : vector<16x4xf32> to vector<16x4xbf16>
    %cst_12 = arith.constant dense<0.000000e+00> : vector<16x32xf32>
    %16 = tpu.matmul %15, %6, %cst_12 {dimension_numbers = #tpu.dot_dimension_numbers<[1], [0], [0], [1], [0, 0, 1, 1], [], []>} : vector<16x4xbf16>, vector<4x32xbf16>, vector<16x32xf32> -> vector<16x32xf32>
    %17 = vector.shape_cast %16 : vector<16x32xf32> to vector<16x1x32xf32>
    %18 = vector.broadcast %17 : vector<16x1x32xf32> to vector<16x16x32xf32>
    %19 = arith.addf %14, %18 : vector<16x16x32xf32>
    %20 = vector.shape_cast %7 : vector<1x32xf32> to vector<1x1x32xf32>
    %21 = vector.broadcast %20 : vector<1x1x32xf32> to vector<16x16x32xf32>
    %22 = arith.addf %19, %21 : vector<16x16x32xf32>
    %cst_13 = arith.constant 0.000000e+00 : f32
    %23 = vector.broadcast %cst_13 : f32 to vector<16x16x32xf32>
    %24 = arith.maximumf %22, %23 : vector<16x16x32xf32>
    %25 = arith.truncf %24 : vector<16x16x32xf32> to vector<16x16x32xbf16>
    %26 = vector.shape_cast %25 : vector<16x16x32xbf16> to vector<256x32xbf16>
    %c0_14 = arith.constant 0 : index
    %c0_15 = arith.constant 0 : index
    %27 = vector.load %arg6[%c0_14, %c0_15] : memref<32x96xbf16, #tpu.memory_space<vmem>>, vector<32x96xbf16>
    %cst_16 = arith.constant dense<0.000000e+00> : vector<256x96xf32>
    %28 = tpu.matmul %26, %27, %cst_16 {dimension_numbers = #tpu.dot_dimension_numbers<[1], [0], [0], [1], [0, 0, 1, 1], [], []>} : vector<256x32xbf16>, vector<32x96xbf16>, vector<256x96xf32> -> vector<256x96xf32>
    %c0_17 = arith.constant 0 : index
    %c0_18 = arith.constant 0 : index
    %29 = vector.load %arg9[%c0_17, %c0_18] : memref<1x96xf32, #tpu.memory_space<vmem>>, vector<1x96xf32>
    %30 = vector.broadcast %29 : vector<1x96xf32> to vector<256x96xf32>
    %31 = arith.addf %28, %30 : vector<256x96xf32>
    %32 = vector.shape_cast %31 : vector<256x96xf32> to vector<2x8x16x96xf32>
    %33 = vector.extract_strided_slice %32 {offsets = [0, 0, 0, 0], sizes = [2, 8, 16, 32], strides = [1, 1, 1, 1]} : vector<2x8x16x96xf32> to vector<2x8x16x32xf32>
    %34 = vector.extract_strided_slice %32 {offsets = [0, 0, 0, 32], sizes = [2, 8, 16, 32], strides = [1, 1, 1, 1]} : vector<2x8x16x96xf32> to vector<2x8x16x32xf32>
    %35 = vector.extract_strided_slice %32 {offsets = [0, 0, 0, 64], sizes = [2, 8, 16, 32], strides = [1, 1, 1, 1]} : vector<2x8x16x96xf32> to vector<2x8x16x32xf32>
    %c0_19 = arith.constant 0 : index
    %c0_20 = arith.constant 0 : index
    %36 = vector.load %arg7[%c0_19, %c0_20] : memref<32x64xbf16, #tpu.memory_space<vmem>>, vector<32x64xbf16>
    %c0_21 = arith.constant 0 : index
    %c0_22 = arith.constant 0 : index
    %37 = vector.load %arg8[%c0_21, %c0_22] : memref<32x32xbf16, #tpu.memory_space<vmem>>, vector<32x32xbf16>
    %c0_23 = arith.constant 0 : index
    %c0_24 = arith.constant 0 : index
    %38 = vector.load %arg13[%c0_23, %c0_24] : memref<32x32xf32, #tpu.memory_space<vmem>>, vector<32x32xf32>
    %39 = arith.truncf %38 : vector<32x32xf32> to vector<32x32xbf16>
    %cst_25 = arith.constant dense<0.000000e+00> : vector<32x64xf32>
    %40 = tpu.matmul %39, %36, %cst_25 {dimension_numbers = #tpu.dot_dimension_numbers<[1], [0], [0], [1], [0, 0, 1, 1], [], []>} : vector<32x32xbf16>, vector<32x64xbf16>, vector<32x64xf32> -> vector<32x64xf32>
    %41 = vector.extract_strided_slice %33 {offsets = [0, 0, 0, 0], sizes = [2, 1, 16, 32], strides = [1, 1, 1, 1]} : vector<2x8x16x32xf32> to vector<2x1x16x32xf32>
    %42 = vector.shape_cast %41 : vector<2x1x16x32xf32> to vector<2x16x32xf32>
    %43 = vector.shape_cast %42 : vector<2x16x32xf32> to vector<32x32xf32>
    %44 = vector.extract_strided_slice %40 {offsets = [0, 0], sizes = [32, 32], strides = [1, 1]} : vector<32x64xf32> to vector<32x32xf32>
    %45 = arith.addf %43, %44 : vector<32x32xf32>
    %46 = arith.negf %45 : vector<32x32xf32>
    %47 = math.exp %46 : vector<32x32xf32>
    %cst_26 = arith.constant 1.000000e+00 : f32
    %48 = vector.broadcast %cst_26 : f32 to vector<32x32xf32>
    %49 = arith.addf %48, %47 : vector<32x32xf32>
    %50 = arith.divf %48, %49 : vector<32x32xf32>
    %51 = vector.extract_strided_slice %34 {offsets = [0, 0, 0, 0], sizes = [2, 1, 16, 32], strides = [1, 1, 1, 1]} : vector<2x8x16x32xf32> to vector<2x1x16x32xf32>
    %52 = vector.shape_cast %51 : vector<2x1x16x32xf32> to vector<2x16x32xf32>
    %53 = vector.shape_cast %52 : vector<2x16x32xf32> to vector<32x32xf32>
    %54 = vector.extract_strided_slice %40 {offsets = [0, 32], sizes = [32, 32], strides = [1, 1]} : vector<32x64xf32> to vector<32x32xf32>
    %55 = arith.addf %53, %54 : vector<32x32xf32>
    %56 = arith.negf %55 : vector<32x32xf32>
    %57 = math.exp %56 : vector<32x32xf32>
    %cst_27 = arith.constant 1.000000e+00 : f32
    %58 = vector.broadcast %cst_27 : f32 to vector<32x32xf32>
    %59 = arith.addf %58, %57 : vector<32x32xf32>
    %60 = arith.divf %58, %59 : vector<32x32xf32>
    %61 = vector.extract_strided_slice %35 {offsets = [0, 0, 0, 0], sizes = [2, 1, 16, 32], strides = [1, 1, 1, 1]} : vector<2x8x16x32xf32> to vector<2x1x16x32xf32>
    %62 = vector.shape_cast %61 : vector<2x1x16x32xf32> to vector<2x16x32xf32>
    %63 = vector.shape_cast %62 : vector<2x16x32xf32> to vector<32x32xf32>
    %64 = arith.mulf %60, %38 : vector<32x32xf32>
    %65 = arith.truncf %64 : vector<32x32xf32> to vector<32x32xbf16>
    %cst_28 = arith.constant dense<0.000000e+00> : vector<32x32xf32>
    %66 = tpu.matmul %65, %37, %cst_28 {dimension_numbers = #tpu.dot_dimension_numbers<[1], [0], [0], [1], [0, 0, 1, 1], [], []>} : vector<32x32xbf16>, vector<32x32xbf16>, vector<32x32xf32> -> vector<32x32xf32>
    %67 = arith.addf %63, %66 : vector<32x32xf32>
    %68 = math.tanh %67 : vector<32x32xf32>
    %69 = arith.mulf %50, %38 : vector<32x32xf32>
    %cst_29 = arith.constant 1.000000e+00 : f32
    %70 = vector.broadcast %cst_29 : f32 to vector<32x32xf32>
    %71 = arith.subf %70, %50 : vector<32x32xf32>
    %72 = arith.mulf %71, %68 : vector<32x32xf32>
    %73 = arith.addf %69, %72 : vector<32x32xf32>
    %74 = arith.truncf %73 : vector<32x32xf32> to vector<32x32xbf16>
    %cst_30 = arith.constant dense<0.000000e+00> : vector<32x64xf32>
    %75 = tpu.matmul %74, %36, %cst_30 {dimension_numbers = #tpu.dot_dimension_numbers<[1], [0], [0], [1], [0, 0, 1, 1], [], []>} : vector<32x32xbf16>, vector<32x64xbf16>, vector<32x64xf32> -> vector<32x64xf32>
    %76 = vector.extract_strided_slice %33 {offsets = [0, 1, 0, 0], sizes = [2, 1, 16, 32], strides = [1, 1, 1, 1]} : vector<2x8x16x32xf32> to vector<2x1x16x32xf32>
    %77 = vector.shape_cast %76 : vector<2x1x16x32xf32> to vector<2x16x32xf32>
    %78 = vector.shape_cast %77 : vector<2x16x32xf32> to vector<32x32xf32>
    %79 = vector.extract_strided_slice %75 {offsets = [0, 0], sizes = [32, 32], strides = [1, 1]} : vector<32x64xf32> to vector<32x32xf32>
    %80 = arith.addf %78, %79 : vector<32x32xf32>
    %81 = arith.negf %80 : vector<32x32xf32>
    %82 = math.exp %81 : vector<32x32xf32>
    %cst_31 = arith.constant 1.000000e+00 : f32
    %83 = vector.broadcast %cst_31 : f32 to vector<32x32xf32>
    %84 = arith.addf %83, %82 : vector<32x32xf32>
    %85 = arith.divf %83, %84 : vector<32x32xf32>
    %86 = vector.extract_strided_slice %34 {offsets = [0, 1, 0, 0], sizes = [2, 1, 16, 32], strides = [1, 1, 1, 1]} : vector<2x8x16x32xf32> to vector<2x1x16x32xf32>
    %87 = vector.shape_cast %86 : vector<2x1x16x32xf32> to vector<2x16x32xf32>
    %88 = vector.shape_cast %87 : vector<2x16x32xf32> to vector<32x32xf32>
    %89 = vector.extract_strided_slice %75 {offsets = [0, 32], sizes = [32, 32], strides = [1, 1]} : vector<32x64xf32> to vector<32x32xf32>
    %90 = arith.addf %88, %89 : vector<32x32xf32>
    %91 = arith.negf %90 : vector<32x32xf32>
    %92 = math.exp %91 : vector<32x32xf32>
    %cst_32 = arith.constant 1.000000e+00 : f32
    %93 = vector.broadcast %cst_32 : f32 to vector<32x32xf32>
    %94 = arith.addf %93, %92 : vector<32x32xf32>
    %95 = arith.divf %93, %94 : vector<32x32xf32>
    %96 = vector.extract_strided_slice %35 {offsets = [0, 1, 0, 0], sizes = [2, 1, 16, 32], strides = [1, 1, 1, 1]} : vector<2x8x16x32xf32> to vector<2x1x16x32xf32>
    %97 = vector.shape_cast %96 : vector<2x1x16x32xf32> to vector<2x16x32xf32>
    %98 = vector.shape_cast %97 : vector<2x16x32xf32> to vector<32x32xf32>
    %99 = arith.mulf %95, %73 : vector<32x32xf32>
    %100 = arith.truncf %99 : vector<32x32xf32> to vector<32x32xbf16>
    %cst_33 = arith.constant dense<0.000000e+00> : vector<32x32xf32>
    %101 = tpu.matmul %100, %37, %cst_33 {dimension_numbers = #tpu.dot_dimension_numbers<[1], [0], [0], [1], [0, 0, 1, 1], [], []>} : vector<32x32xbf16>, vector<32x32xbf16>, vector<32x32xf32> -> vector<32x32xf32>
    %102 = arith.addf %98, %101 : vector<32x32xf32>
    %103 = math.tanh %102 : vector<32x32xf32>
    %104 = arith.mulf %85, %73 : vector<32x32xf32>
    %cst_34 = arith.constant 1.000000e+00 : f32
    %105 = vector.broadcast %cst_34 : f32 to vector<32x32xf32>
    %106 = arith.subf %105, %85 : vector<32x32xf32>
    %107 = arith.mulf %106, %103 : vector<32x32xf32>
    %108 = arith.addf %104, %107 : vector<32x32xf32>
    %109 = arith.truncf %108 : vector<32x32xf32> to vector<32x32xbf16>
    %cst_35 = arith.constant dense<0.000000e+00> : vector<32x64xf32>
    %110 = tpu.matmul %109, %36, %cst_35 {dimension_numbers = #tpu.dot_dimension_numbers<[1], [0], [0], [1], [0, 0, 1, 1], [], []>} : vector<32x32xbf16>, vector<32x64xbf16>, vector<32x64xf32> -> vector<32x64xf32>
    %111 = vector.extract_strided_slice %33 {offsets = [0, 2, 0, 0], sizes = [2, 1, 16, 32], strides = [1, 1, 1, 1]} : vector<2x8x16x32xf32> to vector<2x1x16x32xf32>
    %112 = vector.shape_cast %111 : vector<2x1x16x32xf32> to vector<2x16x32xf32>
    %113 = vector.shape_cast %112 : vector<2x16x32xf32> to vector<32x32xf32>
    %114 = vector.extract_strided_slice %110 {offsets = [0, 0], sizes = [32, 32], strides = [1, 1]} : vector<32x64xf32> to vector<32x32xf32>
    %115 = arith.addf %113, %114 : vector<32x32xf32>
    %116 = arith.negf %115 : vector<32x32xf32>
    %117 = math.exp %116 : vector<32x32xf32>
    %cst_36 = arith.constant 1.000000e+00 : f32
    %118 = vector.broadcast %cst_36 : f32 to vector<32x32xf32>
    %119 = arith.addf %118, %117 : vector<32x32xf32>
    %120 = arith.divf %118, %119 : vector<32x32xf32>
    %121 = vector.extract_strided_slice %34 {offsets = [0, 2, 0, 0], sizes = [2, 1, 16, 32], strides = [1, 1, 1, 1]} : vector<2x8x16x32xf32> to vector<2x1x16x32xf32>
    %122 = vector.shape_cast %121 : vector<2x1x16x32xf32> to vector<2x16x32xf32>
    %123 = vector.shape_cast %122 : vector<2x16x32xf32> to vector<32x32xf32>
    %124 = vector.extract_strided_slice %110 {offsets = [0, 32], sizes = [32, 32], strides = [1, 1]} : vector<32x64xf32> to vector<32x32xf32>
    %125 = arith.addf %123, %124 : vector<32x32xf32>
    %126 = arith.negf %125 : vector<32x32xf32>
    %127 = math.exp %126 : vector<32x32xf32>
    %cst_37 = arith.constant 1.000000e+00 : f32
    %128 = vector.broadcast %cst_37 : f32 to vector<32x32xf32>
    %129 = arith.addf %128, %127 : vector<32x32xf32>
    %130 = arith.divf %128, %129 : vector<32x32xf32>
    %131 = vector.extract_strided_slice %35 {offsets = [0, 2, 0, 0], sizes = [2, 1, 16, 32], strides = [1, 1, 1, 1]} : vector<2x8x16x32xf32> to vector<2x1x16x32xf32>
    %132 = vector.shape_cast %131 : vector<2x1x16x32xf32> to vector<2x16x32xf32>
    %133 = vector.shape_cast %132 : vector<2x16x32xf32> to vector<32x32xf32>
    %134 = arith.mulf %130, %108 : vector<32x32xf32>
    %135 = arith.truncf %134 : vector<32x32xf32> to vector<32x32xbf16>
    %cst_38 = arith.constant dense<0.000000e+00> : vector<32x32xf32>
    %136 = tpu.matmul %135, %37, %cst_38 {dimension_numbers = #tpu.dot_dimension_numbers<[1], [0], [0], [1], [0, 0, 1, 1], [], []>} : vector<32x32xbf16>, vector<32x32xbf16>, vector<32x32xf32> -> vector<32x32xf32>
    %137 = arith.addf %133, %136 : vector<32x32xf32>
    %138 = math.tanh %137 : vector<32x32xf32>
    %139 = arith.mulf %120, %108 : vector<32x32xf32>
    %cst_39 = arith.constant 1.000000e+00 : f32
    %140 = vector.broadcast %cst_39 : f32 to vector<32x32xf32>
    %141 = arith.subf %140, %120 : vector<32x32xf32>
    %142 = arith.mulf %141, %138 : vector<32x32xf32>
    %143 = arith.addf %139, %142 : vector<32x32xf32>
    %144 = arith.truncf %143 : vector<32x32xf32> to vector<32x32xbf16>
    %cst_40 = arith.constant dense<0.000000e+00> : vector<32x64xf32>
    %145 = tpu.matmul %144, %36, %cst_40 {dimension_numbers = #tpu.dot_dimension_numbers<[1], [0], [0], [1], [0, 0, 1, 1], [], []>} : vector<32x32xbf16>, vector<32x64xbf16>, vector<32x64xf32> -> vector<32x64xf32>
    %146 = vector.extract_strided_slice %33 {offsets = [0, 3, 0, 0], sizes = [2, 1, 16, 32], strides = [1, 1, 1, 1]} : vector<2x8x16x32xf32> to vector<2x1x16x32xf32>
    %147 = vector.shape_cast %146 : vector<2x1x16x32xf32> to vector<2x16x32xf32>
    %148 = vector.shape_cast %147 : vector<2x16x32xf32> to vector<32x32xf32>
    %149 = vector.extract_strided_slice %145 {offsets = [0, 0], sizes = [32, 32], strides = [1, 1]} : vector<32x64xf32> to vector<32x32xf32>
    %150 = arith.addf %148, %149 : vector<32x32xf32>
    %151 = arith.negf %150 : vector<32x32xf32>
    %152 = math.exp %151 : vector<32x32xf32>
    %cst_41 = arith.constant 1.000000e+00 : f32
    %153 = vector.broadcast %cst_41 : f32 to vector<32x32xf32>
    %154 = arith.addf %153, %152 : vector<32x32xf32>
    %155 = arith.divf %153, %154 : vector<32x32xf32>
    %156 = vector.extract_strided_slice %34 {offsets = [0, 3, 0, 0], sizes = [2, 1, 16, 32], strides = [1, 1, 1, 1]} : vector<2x8x16x32xf32> to vector<2x1x16x32xf32>
    %157 = vector.shape_cast %156 : vector<2x1x16x32xf32> to vector<2x16x32xf32>
    %158 = vector.shape_cast %157 : vector<2x16x32xf32> to vector<32x32xf32>
    %159 = vector.extract_strided_slice %145 {offsets = [0, 32], sizes = [32, 32], strides = [1, 1]} : vector<32x64xf32> to vector<32x32xf32>
    %160 = arith.addf %158, %159 : vector<32x32xf32>
    %161 = arith.negf %160 : vector<32x32xf32>
    %162 = math.exp %161 : vector<32x32xf32>
    %cst_42 = arith.constant 1.000000e+00 : f32
    %163 = vector.broadcast %cst_42 : f32 to vector<32x32xf32>
    %164 = arith.addf %163, %162 : vector<32x32xf32>
    %165 = arith.divf %163, %164 : vector<32x32xf32>
    %166 = vector.extract_strided_slice %35 {offsets = [0, 3, 0, 0], sizes = [2, 1, 16, 32], strides = [1, 1, 1, 1]} : vector<2x8x16x32xf32> to vector<2x1x16x32xf32>
    %167 = vector.shape_cast %166 : vector<2x1x16x32xf32> to vector<2x16x32xf32>
    %168 = vector.shape_cast %167 : vector<2x16x32xf32> to vector<32x32xf32>
    %169 = arith.mulf %165, %143 : vector<32x32xf32>
    %170 = arith.truncf %169 : vector<32x32xf32> to vector<32x32xbf16>
    %cst_43 = arith.constant dense<0.000000e+00> : vector<32x32xf32>
    %171 = tpu.matmul %170, %37, %cst_43 {dimension_numbers = #tpu.dot_dimension_numbers<[1], [0], [0], [1], [0, 0, 1, 1], [], []>} : vector<32x32xbf16>, vector<32x32xbf16>, vector<32x32xf32> -> vector<32x32xf32>
    %172 = arith.addf %168, %171 : vector<32x32xf32>
    %173 = math.tanh %172 : vector<32x32xf32>
    %174 = arith.mulf %155, %143 : vector<32x32xf32>
    %cst_44 = arith.constant 1.000000e+00 : f32
    %175 = vector.broadcast %cst_44 : f32 to vector<32x32xf32>
    %176 = arith.subf %175, %155 : vector<32x32xf32>
    %177 = arith.mulf %176, %173 : vector<32x32xf32>
    %178 = arith.addf %174, %177 : vector<32x32xf32>
    %179 = arith.truncf %178 : vector<32x32xf32> to vector<32x32xbf16>
    %cst_45 = arith.constant dense<0.000000e+00> : vector<32x64xf32>
    %180 = tpu.matmul %179, %36, %cst_45 {dimension_numbers = #tpu.dot_dimension_numbers<[1], [0], [0], [1], [0, 0, 1, 1], [], []>} : vector<32x32xbf16>, vector<32x64xbf16>, vector<32x64xf32> -> vector<32x64xf32>
    %181 = vector.extract_strided_slice %33 {offsets = [0, 4, 0, 0], sizes = [2, 1, 16, 32], strides = [1, 1, 1, 1]} : vector<2x8x16x32xf32> to vector<2x1x16x32xf32>
    %182 = vector.shape_cast %181 : vector<2x1x16x32xf32> to vector<2x16x32xf32>
    %183 = vector.shape_cast %182 : vector<2x16x32xf32> to vector<32x32xf32>
    %184 = vector.extract_strided_slice %180 {offsets = [0, 0], sizes = [32, 32], strides = [1, 1]} : vector<32x64xf32> to vector<32x32xf32>
    %185 = arith.addf %183, %184 : vector<32x32xf32>
    %186 = arith.negf %185 : vector<32x32xf32>
    %187 = math.exp %186 : vector<32x32xf32>
    %cst_46 = arith.constant 1.000000e+00 : f32
    %188 = vector.broadcast %cst_46 : f32 to vector<32x32xf32>
    %189 = arith.addf %188, %187 : vector<32x32xf32>
    %190 = arith.divf %188, %189 : vector<32x32xf32>
    %191 = vector.extract_strided_slice %34 {offsets = [0, 4, 0, 0], sizes = [2, 1, 16, 32], strides = [1, 1, 1, 1]} : vector<2x8x16x32xf32> to vector<2x1x16x32xf32>
    %192 = vector.shape_cast %191 : vector<2x1x16x32xf32> to vector<2x16x32xf32>
    %193 = vector.shape_cast %192 : vector<2x16x32xf32> to vector<32x32xf32>
    %194 = vector.extract_strided_slice %180 {offsets = [0, 32], sizes = [32, 32], strides = [1, 1]} : vector<32x64xf32> to vector<32x32xf32>
    %195 = arith.addf %193, %194 : vector<32x32xf32>
    %196 = arith.negf %195 : vector<32x32xf32>
    %197 = math.exp %196 : vector<32x32xf32>
    %cst_47 = arith.constant 1.000000e+00 : f32
    %198 = vector.broadcast %cst_47 : f32 to vector<32x32xf32>
    %199 = arith.addf %198, %197 : vector<32x32xf32>
    %200 = arith.divf %198, %199 : vector<32x32xf32>
    %201 = vector.extract_strided_slice %35 {offsets = [0, 4, 0, 0], sizes = [2, 1, 16, 32], strides = [1, 1, 1, 1]} : vector<2x8x16x32xf32> to vector<2x1x16x32xf32>
    %202 = vector.shape_cast %201 : vector<2x1x16x32xf32> to vector<2x16x32xf32>
    %203 = vector.shape_cast %202 : vector<2x16x32xf32> to vector<32x32xf32>
    %204 = arith.mulf %200, %178 : vector<32x32xf32>
    %205 = arith.truncf %204 : vector<32x32xf32> to vector<32x32xbf16>
    %cst_48 = arith.constant dense<0.000000e+00> : vector<32x32xf32>
    %206 = tpu.matmul %205, %37, %cst_48 {dimension_numbers = #tpu.dot_dimension_numbers<[1], [0], [0], [1], [0, 0, 1, 1], [], []>} : vector<32x32xbf16>, vector<32x32xbf16>, vector<32x32xf32> -> vector<32x32xf32>
    %207 = arith.addf %203, %206 : vector<32x32xf32>
    %208 = math.tanh %207 : vector<32x32xf32>
    %209 = arith.mulf %190, %178 : vector<32x32xf32>
    %cst_49 = arith.constant 1.000000e+00 : f32
    %210 = vector.broadcast %cst_49 : f32 to vector<32x32xf32>
    %211 = arith.subf %210, %190 : vector<32x32xf32>
    %212 = arith.mulf %211, %208 : vector<32x32xf32>
    %213 = arith.addf %209, %212 : vector<32x32xf32>
    %214 = arith.truncf %213 : vector<32x32xf32> to vector<32x32xbf16>
    %cst_50 = arith.constant dense<0.000000e+00> : vector<32x64xf32>
    %215 = tpu.matmul %214, %36, %cst_50 {dimension_numbers = #tpu.dot_dimension_numbers<[1], [0], [0], [1], [0, 0, 1, 1], [], []>} : vector<32x32xbf16>, vector<32x64xbf16>, vector<32x64xf32> -> vector<32x64xf32>
    %216 = vector.extract_strided_slice %33 {offsets = [0, 5, 0, 0], sizes = [2, 1, 16, 32], strides = [1, 1, 1, 1]} : vector<2x8x16x32xf32> to vector<2x1x16x32xf32>
    %217 = vector.shape_cast %216 : vector<2x1x16x32xf32> to vector<2x16x32xf32>
    %218 = vector.shape_cast %217 : vector<2x16x32xf32> to vector<32x32xf32>
    %219 = vector.extract_strided_slice %215 {offsets = [0, 0], sizes = [32, 32], strides = [1, 1]} : vector<32x64xf32> to vector<32x32xf32>
    %220 = arith.addf %218, %219 : vector<32x32xf32>
    %221 = arith.negf %220 : vector<32x32xf32>
    %222 = math.exp %221 : vector<32x32xf32>
    %cst_51 = arith.constant 1.000000e+00 : f32
    %223 = vector.broadcast %cst_51 : f32 to vector<32x32xf32>
    %224 = arith.addf %223, %222 : vector<32x32xf32>
    %225 = arith.divf %223, %224 : vector<32x32xf32>
    %226 = vector.extract_strided_slice %34 {offsets = [0, 5, 0, 0], sizes = [2, 1, 16, 32], strides = [1, 1, 1, 1]} : vector<2x8x16x32xf32> to vector<2x1x16x32xf32>
    %227 = vector.shape_cast %226 : vector<2x1x16x32xf32> to vector<2x16x32xf32>
    %228 = vector.shape_cast %227 : vector<2x16x32xf32> to vector<32x32xf32>
    %229 = vector.extract_strided_slice %215 {offsets = [0, 32], sizes = [32, 32], strides = [1, 1]} : vector<32x64xf32> to vector<32x32xf32>
    %230 = arith.addf %228, %229 : vector<32x32xf32>
    %231 = arith.negf %230 : vector<32x32xf32>
    %232 = math.exp %231 : vector<32x32xf32>
    %cst_52 = arith.constant 1.000000e+00 : f32
    %233 = vector.broadcast %cst_52 : f32 to vector<32x32xf32>
    %234 = arith.addf %233, %232 : vector<32x32xf32>
    %235 = arith.divf %233, %234 : vector<32x32xf32>
    %236 = vector.extract_strided_slice %35 {offsets = [0, 5, 0, 0], sizes = [2, 1, 16, 32], strides = [1, 1, 1, 1]} : vector<2x8x16x32xf32> to vector<2x1x16x32xf32>
    %237 = vector.shape_cast %236 : vector<2x1x16x32xf32> to vector<2x16x32xf32>
    %238 = vector.shape_cast %237 : vector<2x16x32xf32> to vector<32x32xf32>
    %239 = arith.mulf %235, %213 : vector<32x32xf32>
    %240 = arith.truncf %239 : vector<32x32xf32> to vector<32x32xbf16>
    %cst_53 = arith.constant dense<0.000000e+00> : vector<32x32xf32>
    %241 = tpu.matmul %240, %37, %cst_53 {dimension_numbers = #tpu.dot_dimension_numbers<[1], [0], [0], [1], [0, 0, 1, 1], [], []>} : vector<32x32xbf16>, vector<32x32xbf16>, vector<32x32xf32> -> vector<32x32xf32>
    %242 = arith.addf %238, %241 : vector<32x32xf32>
    %243 = math.tanh %242 : vector<32x32xf32>
    %244 = arith.mulf %225, %213 : vector<32x32xf32>
    %cst_54 = arith.constant 1.000000e+00 : f32
    %245 = vector.broadcast %cst_54 : f32 to vector<32x32xf32>
    %246 = arith.subf %245, %225 : vector<32x32xf32>
    %247 = arith.mulf %246, %243 : vector<32x32xf32>
    %248 = arith.addf %244, %247 : vector<32x32xf32>
    %249 = arith.truncf %248 : vector<32x32xf32> to vector<32x32xbf16>
    %cst_55 = arith.constant dense<0.000000e+00> : vector<32x64xf32>
    %250 = tpu.matmul %249, %36, %cst_55 {dimension_numbers = #tpu.dot_dimension_numbers<[1], [0], [0], [1], [0, 0, 1, 1], [], []>} : vector<32x32xbf16>, vector<32x64xbf16>, vector<32x64xf32> -> vector<32x64xf32>
    %251 = vector.extract_strided_slice %33 {offsets = [0, 6, 0, 0], sizes = [2, 1, 16, 32], strides = [1, 1, 1, 1]} : vector<2x8x16x32xf32> to vector<2x1x16x32xf32>
    %252 = vector.shape_cast %251 : vector<2x1x16x32xf32> to vector<2x16x32xf32>
    %253 = vector.shape_cast %252 : vector<2x16x32xf32> to vector<32x32xf32>
    %254 = vector.extract_strided_slice %250 {offsets = [0, 0], sizes = [32, 32], strides = [1, 1]} : vector<32x64xf32> to vector<32x32xf32>
    %255 = arith.addf %253, %254 : vector<32x32xf32>
    %256 = arith.negf %255 : vector<32x32xf32>
    %257 = math.exp %256 : vector<32x32xf32>
    %cst_56 = arith.constant 1.000000e+00 : f32
    %258 = vector.broadcast %cst_56 : f32 to vector<32x32xf32>
    %259 = arith.addf %258, %257 : vector<32x32xf32>
    %260 = arith.divf %258, %259 : vector<32x32xf32>
    %261 = vector.extract_strided_slice %34 {offsets = [0, 6, 0, 0], sizes = [2, 1, 16, 32], strides = [1, 1, 1, 1]} : vector<2x8x16x32xf32> to vector<2x1x16x32xf32>
    %262 = vector.shape_cast %261 : vector<2x1x16x32xf32> to vector<2x16x32xf32>
    %263 = vector.shape_cast %262 : vector<2x16x32xf32> to vector<32x32xf32>
    %264 = vector.extract_strided_slice %250 {offsets = [0, 32], sizes = [32, 32], strides = [1, 1]} : vector<32x64xf32> to vector<32x32xf32>
    %265 = arith.addf %263, %264 : vector<32x32xf32>
    %266 = arith.negf %265 : vector<32x32xf32>
    %267 = math.exp %266 : vector<32x32xf32>
    %cst_57 = arith.constant 1.000000e+00 : f32
    %268 = vector.broadcast %cst_57 : f32 to vector<32x32xf32>
    %269 = arith.addf %268, %267 : vector<32x32xf32>
    %270 = arith.divf %268, %269 : vector<32x32xf32>
    %271 = vector.extract_strided_slice %35 {offsets = [0, 6, 0, 0], sizes = [2, 1, 16, 32], strides = [1, 1, 1, 1]} : vector<2x8x16x32xf32> to vector<2x1x16x32xf32>
    %272 = vector.shape_cast %271 : vector<2x1x16x32xf32> to vector<2x16x32xf32>
    %273 = vector.shape_cast %272 : vector<2x16x32xf32> to vector<32x32xf32>
    %274 = arith.mulf %270, %248 : vector<32x32xf32>
    %275 = arith.truncf %274 : vector<32x32xf32> to vector<32x32xbf16>
    %cst_58 = arith.constant dense<0.000000e+00> : vector<32x32xf32>
    %276 = tpu.matmul %275, %37, %cst_58 {dimension_numbers = #tpu.dot_dimension_numbers<[1], [0], [0], [1], [0, 0, 1, 1], [], []>} : vector<32x32xbf16>, vector<32x32xbf16>, vector<32x32xf32> -> vector<32x32xf32>
    %277 = arith.addf %273, %276 : vector<32x32xf32>
    %278 = math.tanh %277 : vector<32x32xf32>
    %279 = arith.mulf %260, %248 : vector<32x32xf32>
    %cst_59 = arith.constant 1.000000e+00 : f32
    %280 = vector.broadcast %cst_59 : f32 to vector<32x32xf32>
    %281 = arith.subf %280, %260 : vector<32x32xf32>
    %282 = arith.mulf %281, %278 : vector<32x32xf32>
    %283 = arith.addf %279, %282 : vector<32x32xf32>
    %284 = arith.truncf %283 : vector<32x32xf32> to vector<32x32xbf16>
    %cst_60 = arith.constant dense<0.000000e+00> : vector<32x64xf32>
    %285 = tpu.matmul %284, %36, %cst_60 {dimension_numbers = #tpu.dot_dimension_numbers<[1], [0], [0], [1], [0, 0, 1, 1], [], []>} : vector<32x32xbf16>, vector<32x64xbf16>, vector<32x64xf32> -> vector<32x64xf32>
    %286 = vector.extract_strided_slice %33 {offsets = [0, 7, 0, 0], sizes = [2, 1, 16, 32], strides = [1, 1, 1, 1]} : vector<2x8x16x32xf32> to vector<2x1x16x32xf32>
    %287 = vector.shape_cast %286 : vector<2x1x16x32xf32> to vector<2x16x32xf32>
    %288 = vector.shape_cast %287 : vector<2x16x32xf32> to vector<32x32xf32>
    %289 = vector.extract_strided_slice %285 {offsets = [0, 0], sizes = [32, 32], strides = [1, 1]} : vector<32x64xf32> to vector<32x32xf32>
    %290 = arith.addf %288, %289 : vector<32x32xf32>
    %291 = arith.negf %290 : vector<32x32xf32>
    %292 = math.exp %291 : vector<32x32xf32>
    %cst_61 = arith.constant 1.000000e+00 : f32
    %293 = vector.broadcast %cst_61 : f32 to vector<32x32xf32>
    %294 = arith.addf %293, %292 : vector<32x32xf32>
    %295 = arith.divf %293, %294 : vector<32x32xf32>
    %296 = vector.extract_strided_slice %34 {offsets = [0, 7, 0, 0], sizes = [2, 1, 16, 32], strides = [1, 1, 1, 1]} : vector<2x8x16x32xf32> to vector<2x1x16x32xf32>
    %297 = vector.shape_cast %296 : vector<2x1x16x32xf32> to vector<2x16x32xf32>
    %298 = vector.shape_cast %297 : vector<2x16x32xf32> to vector<32x32xf32>
    %299 = vector.extract_strided_slice %285 {offsets = [0, 32], sizes = [32, 32], strides = [1, 1]} : vector<32x64xf32> to vector<32x32xf32>
    %300 = arith.addf %298, %299 : vector<32x32xf32>
    %301 = arith.negf %300 : vector<32x32xf32>
    %302 = math.exp %301 : vector<32x32xf32>
    %cst_62 = arith.constant 1.000000e+00 : f32
    %303 = vector.broadcast %cst_62 : f32 to vector<32x32xf32>
    %304 = arith.addf %303, %302 : vector<32x32xf32>
    %305 = arith.divf %303, %304 : vector<32x32xf32>
    %306 = vector.extract_strided_slice %35 {offsets = [0, 7, 0, 0], sizes = [2, 1, 16, 32], strides = [1, 1, 1, 1]} : vector<2x8x16x32xf32> to vector<2x1x16x32xf32>
    %307 = vector.shape_cast %306 : vector<2x1x16x32xf32> to vector<2x16x32xf32>
    %308 = vector.shape_cast %307 : vector<2x16x32xf32> to vector<32x32xf32>
    %309 = arith.mulf %305, %283 : vector<32x32xf32>
    %310 = arith.truncf %309 : vector<32x32xf32> to vector<32x32xbf16>
    %cst_63 = arith.constant dense<0.000000e+00> : vector<32x32xf32>
    %311 = tpu.matmul %310, %37, %cst_63 {dimension_numbers = #tpu.dot_dimension_numbers<[1], [0], [0], [1], [0, 0, 1, 1], [], []>} : vector<32x32xbf16>, vector<32x32xbf16>, vector<32x32xf32> -> vector<32x32xf32>
    %312 = arith.addf %308, %311 : vector<32x32xf32>
    %313 = math.tanh %312 : vector<32x32xf32>
    %314 = arith.mulf %295, %283 : vector<32x32xf32>
    %cst_64 = arith.constant 1.000000e+00 : f32
    %315 = vector.broadcast %cst_64 : f32 to vector<32x32xf32>
    %316 = arith.subf %315, %295 : vector<32x32xf32>
    %317 = arith.mulf %316, %313 : vector<32x32xf32>
    %318 = arith.addf %314, %317 : vector<32x32xf32>
    %c0_65 = arith.constant 0 : index
    %c0_66 = arith.constant 0 : index
    %319 = vector.load %arg13[%c0_65, %c0_66] : memref<32x32xf32, #tpu.memory_space<vmem>>, vector<32x32xf32>
    tpu.vector_store %arg13[%c0_65, %c0_66], %318 {strides = array<i32>} : memref<32x32xf32, #tpu.memory_space<vmem>>, vector<32x32xf32>,
    %c0_i32_67 = arith.constant 0 : i32
    %320 = arith.cmpi eq, %arg1, %c0_i32_67 : i32
    %321 = arith.extui %320 : i1 to i32
    %c0_i32_68 = arith.constant 0 : i32
    %322 = arith.cmpi ne, %321, %c0_i32_68 : i32
    scf.if %322 {
      %323 = arith.truncf %318 : vector<32x32xf32> to vector<32x32xbf16>
      %c0_69 = arith.constant 0 : index
      %c0_70 = arith.constant 0 : index
      %324 = vector.load %arg10[%c0_69, %c0_70] : memref<32x128xbf16, #tpu.memory_space<vmem>>, vector<32x128xbf16>
      %cst_71 = arith.constant dense<0.000000e+00> : vector<32x128xf32>
      %325 = tpu.matmul %323, %324, %cst_71 {dimension_numbers = #tpu.dot_dimension_numbers<[1], [0], [0], [1], [0, 0, 1, 1], [], []>} : vector<32x32xbf16>, vector<32x128xbf16>, vector<32x128xf32> -> vector<32x128xf32>
      %c0_72 = arith.constant 0 : index
      %c0_73 = arith.constant 0 : index
      %326 = vector.load %arg11[%c0_72, %c0_73] : memref<1x128xf32, #tpu.memory_space<vmem>>, vector<1x128xf32>
      %327 = vector.broadcast %326 : vector<1x128xf32> to vector<32x128xf32>
      %328 = arith.addf %325, %327 : vector<32x128xf32>
      %c0_74 = arith.constant 0 : index
      %c0_75 = arith.constant 0 : index
      %329 = vector.load %arg12[%c0_74, %c0_75] : memref<32x128xf32, #tpu.memory_space<vmem>>, vector<32x128xf32>
      tpu.vector_store %arg12[%c0_74, %c0_75], %328 {strides = array<i32>} : memref<32x128xf32, #tpu.memory_space<vmem>>, vector<32x128xf32>,
    } else {
    }
    return
  }
  func.func @transform_0(%arg0: i32, %arg1: i32) -> (i32, i32, i32, i32) {
    %c0_i32 = arith.constant 0 : i32
    %c0_i32_0 = arith.constant 0 : i32
    %c0_i32_1 = arith.constant 0 : i32
    return %arg0, %arg1, %c0_i32, %c0_i32_0 : i32, i32, i32, i32
  }
  func.func @transform_1(%arg0: i32, %arg1: i32) -> (i32, i32) {
    %c0_i32 = arith.constant 0 : i32
    %c0_i32_0 = arith.constant 0 : i32
    %c0_i32_1 = arith.constant 0 : i32
    return %c0_i32, %c0_i32_0 : i32, i32
  }
  func.func @transform_2(%arg0: i32, %arg1: i32) -> (i32, i32) {
    %c0_i32 = arith.constant 0 : i32
    %c0_i32_0 = arith.constant 0 : i32
    %c0_i32_1 = arith.constant 0 : i32
    return %c0_i32, %c0_i32_0 : i32, i32
  }
  func.func @transform_3(%arg0: i32, %arg1: i32) -> (i32, i32) {
    %c0_i32 = arith.constant 0 : i32
    %c0_i32_0 = arith.constant 0 : i32
    %c0_i32_1 = arith.constant 0 : i32
    return %c0_i32, %c0_i32_0 : i32, i32
  }
  func.func @transform_4(%arg0: i32, %arg1: i32) -> (i32, i32) {
    %c0_i32 = arith.constant 0 : i32
    %c0_i32_0 = arith.constant 0 : i32
    %c0_i32_1 = arith.constant 0 : i32
    return %c0_i32, %c0_i32_0 : i32, i32
  }
  func.func @transform_5(%arg0: i32, %arg1: i32) -> (i32, i32) {
    %c0_i32 = arith.constant 0 : i32
    %c0_i32_0 = arith.constant 0 : i32
    %c0_i32_1 = arith.constant 0 : i32
    return %c0_i32, %c0_i32_0 : i32, i32
  }
  func.func @transform_6(%arg0: i32, %arg1: i32) -> (i32, i32) {
    %c0_i32 = arith.constant 0 : i32
    %c0_i32_0 = arith.constant 0 : i32
    %c0_i32_1 = arith.constant 0 : i32
    return %c0_i32, %c0_i32_0 : i32, i32
  }
  func.func @transform_7(%arg0: i32, %arg1: i32) -> (i32, i32) {
    %c0_i32 = arith.constant 0 : i32
    %c0_i32_0 = arith.constant 0 : i32
    %c0_i32_1 = arith.constant 0 : i32
    return %c0_i32, %c0_i32_0 : i32, i32
  }
  func.func @transform_8(%arg0: i32, %arg1: i32) -> (i32, i32) {
    %c0_i32 = arith.constant 0 : i32
    %c0_i32_0 = arith.constant 0 : i32
    %c0_i32_1 = arith.constant 0 : i32
    return %c0_i32, %c0_i32_0 : i32, i32
  }
  func.func @transform_9(%arg0: i32, %arg1: i32) -> (i32, i32) {
    %c0_i32 = arith.constant 0 : i32
    %c0_i32_0 = arith.constant 0 : i32
    %c0_i32_1 = arith.constant 0 : i32
    return %c0_i32, %c0_i32_0 : i32, i32
  }
  func.func @transform_10(%arg0: i32, %arg1: i32) -> (i32, i32) {
    %c0_i32 = arith.constant 0 : i32
    %c0_i32_0 = arith.constant 0 : i32
    return %arg0, %c0_i32 : i32, i32
  }
}

</mosaic_0001>

<bundles_post_ra>
// kernel: tpu_custom_call.1
= control target key start
LH: loop header
LB: loop body
LE: loop exit
PB: predicated region body
PF: predicated region fallthrough
CT: control target
= control target key end

     0   :  { %vm307_vm0 = vcmask 1041408   ;;  %vm81_vm1 = vcmask 31744   ;;  %vm41_vm2 = vcmask 261120   ;;  %v3721_v57 = vmov 0.0   ;;  %s4992_s0 = inlined_call_operand.vmem [shape: f32[2,8,16,4], index: 0, kind: input, shape index: {}]   ;;  %s4993_s1 = inlined_call_operand.vmem [shape: bf16[4,32], index: 1, kind: input, shape index: {}]   ;;  %s4994_s2 = inlined_call_operand.vmem [shape: bf16[4,32], index: 2, kind: input, shape index: {}]   ;;  %s4995_s3 = inlined_call_operand.vmem [shape: f32[1,32], index: 3, kind: input, shape index: {}]   ;;  %s4996_s4 = inlined_call_operand.vmem [shape: bf16[32,96], index: 4, kind: input, shape index: {}]   ;;  %s4997_s5 = inlined_call_operand.vmem [shape: bf16[32,64], index: 5, kind: input, shape index: {}]   ;;  %s4998_s6 = inlined_call_operand.vmem [shape: bf16[32,32], index: 6, kind: input, shape index: {}]   ;;  %s4999_s7 = inlined_call_operand.vmem [shape: f32[1,96], index: 7, kind: input, shape index: {}]   ;;  %s5000_s8 = inlined_call_operand.vmem [shape: bf16[32,128], index: 8, kind: input, shape index: {}]   ;;  %s5001_s9 = inlined_call_operand.vmem [shape: f32[1,128], index: 9, kind: input, shape index: {}]   ;;  %s5002_s10 = inlined_call_operand.hbm [shape: f32[32,128], index: 10, kind: output, shape index: {}]  }
   0x1   :  { %v78_v0 = vld [vmem:[%s4993_s1] sm:$0x3]  ;;  %v47_v2 = vld [vmem:[%s4992_s0 + $0x8] sm:$0xff]  ;;  %v48_v7 = vld [vmem:[%s4992_s0 + $0x10] sm:$0xff]  ;;  %42 = vst.msk [vmem:[#allocation2] sm:$0xff] %vm41_vm2, %v3721_v57  ;;  %3304 = vmatprep.subr.bf16.mxu1 %v3721_v57 }
   0x2   :  { %v46_v1 = vld [vmem:[%s4992_s0] sm:$0xff]  ;;  %3482 = vmatprep.subr.msk.bf16.mxu0 %vm307_vm0, %v78_v0  ;;  %v309_v3 = vsel %vm307_vm0, %v78_v0, 0  ;;  %v83_v5 = vsel %vm81_vm1, %v47_v2, 0.0  ;;  %v49_v8 = vld [vmem:[%s4992_s0 + $0x18] sm:$0xff]  ;;  %v91_v11 = vsel %vm81_vm1, %v48_v7, 0.0  ;;  %v51_v14 = vld [vmem:[%s4992_s0 + $0x28] sm:$0xff] }
   0x3   :  { %v82_v4 = vsel %vm81_vm1, %v46_v1, 0.0  ;;  %v243_v6 = vpack.c.bf16 %v47_v2, %v46_v1  ;;  %v50_v9 = vld [vmem:[%s4992_s0 + $0x20] sm:$0xff]  ;;  %3271 = vmatpush3.bf16.msra.mxu0 %v309_v3  ;;  %v92_v12 = vsel %vm81_vm1, %v49_v8, 0.0  ;;  %v244_v13 = vpack.c.bf16 %v49_v8, %v48_v7  ;;  %v52_v15 = vld [vmem:[%s4992_s0 + $0x30] sm:$0xff]  ;;  %v53_v16 = vld [vmem:[%s4992_s0 + $0x38] sm:$0xff]  ;;  %43 = vst.msk [vmem:[#allocation2 + $0x8] sm:$0xff] %vm41_vm2, %v3721_v57 }
   0x4   :  { %v84_v10 = vadd.f32 %v83_v5, %v82_v4  ;;  %v93_v17 = vadd.f32 %v92_v12, %v91_v11  ;;  %v100_v18 = vsel %vm81_vm1, %v50_v9, 0.0  ;;  %v101_v19 = vsel %vm81_vm1, %v51_v14, 0.0  ;;  %v54_v21 = vld [vmem:[%s4992_s0 + $0x40] sm:$0xff]  ;;  %v55_v22 = vld [vmem:[%s4992_s0 + $0x48] sm:$0xff]  ;;  %v3832_v27 = vld [vmem:[%s4992_s0 + $0x50] sm:$0xff]  ;;  %44 = vst.msk [vmem:[#allocation2 + $0x10] sm:$0xff] %vm41_vm2, %v3721_v57 }
   0x5   :  { %3272 = vmatprep.mubr.msk.bf16.mxu0 %vm81_vm1, %v243_v6  ;;  %v245_v20 = vpack.c.bf16 %v51_v14, %v50_v9  ;;  %v102_v24 = vadd.f32 %v101_v19, %v100_v18  ;;  %v109_v25 = vsel %vm81_vm1, %v52_v15, 0.0  ;;  %v110_v26 = vsel %vm81_vm1, %v53_v16, 0.0  ;;  %v3839_v32 = vld [vmem:[%s4992_s0 + $0x58] sm:$0xff]  ;;  %v3852_v49 = vld [vmem:[%s4992_s0 + $0x60] sm:$0xff]  ;;  %v3857_v50 = vld [vmem:[%s4992_s0 + $0x68] sm:$0xff]  ;;  %45 = vst.msk [vmem:[#allocation2 + $0x18] sm:$0xff] %vm41_vm2, %v3721_v57 }
   0x6   :  { %v85_v23 = vrot.slane %v84_v10, 4  ;;  %v94_v28 = vrot.slane %v93_v17, 4  ;;  %3273 = vmatmul.mubr.msk.bf16.vlgmr.msra.gmra.mrb[0].mxu0 %vm81_vm1, %v244_v13  ;;  %v111_v29 = vadd.f32 %v110_v26, %v109_v25  ;;  %v246_v30 = vpack.c.bf16 %v53_v16, %v52_v15  ;;  %v79_v58 = vld [vmem:[%s4994_s2] sm:$0x3]  ;;  %v3888_v8 = vld [vmem:[%s4992_s0 + $0x70] sm:$0xff] }
   0x7   :  { %v118_v31 = vsel %vm81_vm1, %v54_v21, 0.0  ;;  %v103_v34 = vrot.slane %v102_v24, 4  ;;  %3276 = vmatprep.mubr.msk.bf16.mxu0 %vm81_vm1, %v245_v20  ;;  %v119_v35 = vsel %vm81_vm1, %v55_v22, 0.0  ;;  %v247_v36 = vpack.c.bf16 %v55_v22, %v54_v21  ;;  %v3874_v59 = vld [vmem:[%s4997_s5] sm:$0xff]  }
   0x8   :  { %v86_v33 = vadd.f32 %v85_v23, %v84_v10  ;;  %v95_v37 = vadd.f32 %v94_v28, %v93_v17  ;;  %v112_v38 = vrot.slane %v111_v29, 4  ;;  %v120_v39 = vadd.f32 %v119_v35, %v118_v31  ;;  %3346 = vmatprep.subr.bf16.mxu0 %v3874_v59  ;;  %v3895_v17 = vld [vmem:[%s4992_s0 + $0x78] sm:$0xff] }
   0x9   :  { %v127_v40 = vsel %vm81_vm1, %v3832_v27, 0.0  ;;  %v104_v42 = vadd.f32 %v103_v34, %v102_v24  ;;  %v128_v43 = vsel %vm81_vm1, %v3839_v32, 0.0  ;;  %v248_v44 = vpack.c.bf16 %v3839_v32, %v3832_v27  ;;  %3347 = vmatpush3.bf16.msra.mxu0 %v3874_v59 }
   0xa   :  { %v87_v41 = vrot.slane %v86_v33, 2  ;;  %v96_v45 = vrot.slane %v95_v37, 2  ;;  %v113_v46 = vadd.f32 %v112_v38, %v111_v29  ;;  %v121_v47 = vrot.slane %v120_v39, 4 }
   0xb   :  { %v129_v48 = vadd.f32 %v128_v43, %v127_v40  ;;  %v105_v52 = vrot.slane %v104_v42, 2  ;;  %v136_v62 = vsel %vm81_vm1, %v3852_v49, 0.0  ;;  %v137_v63 = vsel %vm81_vm1, %v3857_v50, 0.0 }
   0xc   :  { %v88_v51 = vadd.f32 %v87_v41, %v86_v33  ;;  %v97_v53 = vadd.f32 %v96_v45, %v95_v37  ;;  %v114_v54 = vrot.slane %v113_v46, 2  ;;  %v122_v55 = vadd.f32 %v121_v47, %v120_v39 }
   0xd   :  { %v130_v56 = vrot.slane %v129_v48, 4  ;;  %v106_v61 = vadd.f32 %v105_v52, %v104_v42  ;;  %v138_v6 = vadd.f32 %v137_v63, %v136_v62  ;;  %v249_v7 = vpack.c.bf16 %v3857_v50, %v3852_v49 }
   0xe   :  { %v89_v60 = vrot.slane %v88_v51, 1  ;;  %v98_v0 = vrot.slane %v97_v53, 1  ;;  %v115_v1 = vadd.f32 %v114_v54, %v113_v46  ;;  %3277 = vmatmul.mubr.msk.bf16.gmra.mrb[4].mxu0 %vm81_vm1, %v246_v30  ;;  %v123_v2 = vrot.slane %v122_v55, 2 }
   0xf   :  { %v131_v3 = vadd.f32 %v130_v56, %v129_v48  ;;  %v107_v5 = vrot.slane %v106_v61, 1  ;;  %3280 = vmatprep.mubr.msk.bf16.mxu0 %vm81_vm1, %v247_v36  ;;  %v139_v15 = vrot.slane %v138_v6, 4  ;;  %v546_v16 = vsel %vm307_vm0, %v79_v58, 0 }
  0x10   :  { %v90_v4 = vadd.f32 %v89_v60, %v88_v51  ;;  %v99_v9 = vadd.f32 %v98_v0, %v97_v53  ;;  %v116_v10 = vrot.slane %v115_v1, 1  ;;  %v124_v11 = vadd.f32 %v123_v2, %v122_v55  ;;  %3305 = vmatpush3.bf16.msra.mxu1 %v546_v16 }
  0x11   :  { %v132_v12 = vrot.slane %v131_v3, 2  ;;  %v108_v14 = vadd.f32 %v107_v5, %v106_v61  ;;  %v140_v24 = vadd.f32 %v139_v15, %v138_v6  ;;  %v145_v25 = vsel %vm81_vm1, %v3888_v8, 0.0 }
  0x12   :  { %v227_v13 = vmul.f32 0.0625, %v90_v4  ;;  %v228_v18 = vmul.f32 0.0625, %v99_v9  ;;  %v117_v19 = vadd.f32 %v116_v10, %v115_v1  ;;  %v125_v20 = vrot.slane %v124_v11, 1 }
  0x13   :  { %v133_v21 = vadd.f32 %v132_v12, %v131_v3  ;;  %v229_v23 = vmul.f32 0.0625, %v108_v14  ;;  %v141_v33 = vrot.slane %v140_v24, 2  ;;  %v146_v34 = vsel %vm81_vm1, %v3895_v17, 0.0 }
  0x14   :  { %v472_v22 = vpack.c.bf16 %v227_v13, %v227_v13  ;;  %v473_v26 = vpack.c.bf16 %v228_v18, %v228_v18  ;;  %v230_v28 = vmul.f32 0.0625, %v117_v19  ;;  %v126_v29 = vadd.f32 %v125_v20, %v124_v11 }
  0x15   :  { %v134_v30 = vrot.slane %v133_v21, 1  ;;  %v474_v31 = vpack.c.bf16 %v229_v23, %v229_v23 }
  0x16   :  { %15 = vsyncpa [#allocation4], 0  ;;  %v3901_v35 = vunpack.c.l.b16 %v472_v22  ;;  %v475_v36 = vpack.c.bf16 %v230_v28, %v230_v28  ;;  %v3903_v37 = vmul.f32 0.0625, %v126_v29  ;;  %3281 = vmatmul.mubr.msk.bf16.gmra.mrb[8].mxu0 %vm81_vm1, %v248_v44  ;;  %v3912_v39 = vld [vmem:[%s4992_s0 + $0x80] sm:$0xff]  ;;  %v3917_v40 = vld [vmem:[%s4992_s0 + $0x88] sm:$0xff]  ;;  %v3919_v41 = vunpack.c.l.b16 %v473_v26  ;;  %s3725_s27 = smov 96  }
  0x17   :  { %v135_v38 = vadd.f32 %v134_v30, %v133_v21  ;;  %v3921_v42 = vunpack.c.l.b16 %v474_v31  ;;  %v142_v43 = vadd.f32 %v141_v33, %v140_v24  ;;  %3284 = vmatprep.mubr.msk.bf16.mxu0 %vm81_vm1, %v249_v7  ;;  %v147_v27 = vadd.f32 %v146_v34, %v145_v25  ;;  %v3927_v32 = vld [vmem:[%s4992_s0 + $0x90] sm:$0xff]  ;;  %v3938_v47 = vld [vmem:[%s4992_s0 + $0x98] sm:$0xff]  ;;  %v3943_v48 = vld [vmem:[%s4992_s0 + $0xa0] sm:$0xff]  ;;  %s3726_s28 = smov 64   ;;  %s3727_s20 = smov [#allocation3]  }
  0x18   :  { %v3929_v44 = vunpack.c.l.b16 %v475_v36  ;;  %v250_v46 = vpack.c.bf16 %v3895_v17, %v3888_v8  ;;  %vm3722_vm3 = vmmov 0   ;;  %v3949_v51 = vld [vmem:[%s4992_s0 + $0xa8] sm:$0xff]  ;;  %v3954_v52 = vld [vmem:[%s4992_s0 + $0xb0] sm:$0xff]  ;;  %v154_v53 = vsel %vm81_vm1, %v3912_v39, 0.0  ;;  %v3972_v58 = vld [vmem:[%s4992_s0 + $0xc0] sm:$0xff]  ;;  %s3044_s21 = sshll.u32 %s3727_s20, 4  ;;  %s3045_s21 = int_to_ptr.vmem [resolvable:$true] %s3044_s21 }
  0x19   :  { %v3931_v45 = vmul.f32 0.0625, %v135_v38  ;;  %v143_v49 = vrot.slane %v142_v43, 1  ;;  %v148_v50 = vrot.slane %v147_v27, 4  ;;  %3306 = vmatprep.mubr.msk.bf16.mxu1 %vm3722_vm3, %v3721_v57  ;;  %v155_v54 = vsel %vm81_vm1, %v3917_v40, 0.0  ;;  %v3967_v57 = vld [vmem:[%s4992_s0 + $0xb8] sm:$0xff]  ;;  %v3981_v0 = vld [vmem:[%s4992_s0 + $0xc8] sm:$0xff]  ;;  %p3702_p1 = scmp.lt.s32.totalorder %s3045_s21, %s3045_s21 }
  0x1a   :  { %v476_v55 = vpack.c.bf16 %v3903_v37, %v3903_v37  ;;  %v156_v60 = vadd.f32 %v155_v54, %v154_v53  ;;  %v163_v61 = vsel %vm81_vm1, %v3927_v32, 0.0  ;;  %v164_v1 = vsel %vm81_vm1, %v3938_v47, 0.0  ;;  %v3990_v3 = vld [vmem:[%s4992_s0 + $0xd0] sm:$0xff]  ;;  %v3999_v9 = vld [vmem:[%s4992_s0 + $0xd8] sm:$0xff]  ;;  %v4011_v18 = vld [vmem:[%s4992_s0 + $0xe0] sm:$0xff] }
  0x1b   :  { %v477_v56 = vpack.c.bf16 %v3931_v45, %v3931_v45  ;;  %v3976_v62 = vadd.f32 %v143_v49, %v142_v43  ;;  %v149_v63 = vadd.f32 %v148_v50, %v147_v27  ;;  %v172_v2 = vsel %vm81_vm1, %v3943_v48, 0.0  ;;  %v4020_v26 = vld [vmem:[%s4992_s0 + $0xe8] sm:$0xff]  ;;  %v4027_v43 = vld [vmem:[%s4992_s0 + $0xf0] sm:$0xff] }
  0x1c   :  { %v157_v4 = vrot.slane %v156_v60, 4  ;;  %v165_v5 = vadd.f32 %v164_v1, %v163_v61  ;;  %v173_v6 = vsel %vm81_vm1, %v3949_v51, 0.0  ;;  %v181_v7 = vsel %vm81_vm1, %v3954_v52, 0.0 }
  0x1d   :  { %v150_v8 = vrot.slane %v149_v63, 2  ;;  %v174_v10 = vadd.f32 %v173_v6, %v172_v2  ;;  %v182_v11 = vsel %vm81_vm1, %v3967_v57, 0.0  ;;  %v190_v12 = vsel %vm81_vm1, %v3972_v58, 0.0 }
  0x1e   :  { %3285 = vmatmul.mubr.msk.bf16.gmra.mrb[12].mxu0 %vm81_vm1, %v250_v46  ;;  %v158_v13 = vadd.f32 %v157_v4, %v156_v60  ;;  %v166_v14 = vrot.slane %v165_v5, 4  ;;  %v183_v15 = vadd.f32 %v182_v11, %v181_v7  ;;  %v191_v16 = vsel %vm81_vm1, %v3981_v0, 0.0 }
  0x1f   :  { %v151_v17 = vadd.f32 %v150_v8, %v149_v63  ;;  %v175_v19 = vrot.slane %v174_v10, 4  ;;  %v192_v20 = vadd.f32 %v191_v16, %v190_v12  ;;  %v199_v21 = vsel %vm81_vm1, %v3990_v3, 0.0  ;;  %v4034_v63 = vld [vmem:[%s4992_s0 + $0xf8] sm:$0xff] }
  0x20   :  { %v159_v22 = vrot.slane %v158_v13, 2  ;;  %v167_v23 = vadd.f32 %v166_v14, %v165_v5  ;;  %v184_v24 = vrot.slane %v183_v15, 4  ;;  %v200_v25 = vsel %vm81_vm1, %v3999_v9, 0.0 }
  0x21   :  { %v152_v28 = vrot.slane %v151_v17, 1  ;;  %v176_v29 = vadd.f32 %v175_v19, %v174_v10  ;;  %v193_v30 = vrot.slane %v192_v20, 4  ;;  %v201_v31 = vadd.f32 %v200_v25, %v199_v21 }
  0x22   :  { %v160_v33 = vadd.f32 %v159_v22, %v158_v13  ;;  %v168_v34 = vrot.slane %v167_v23, 2  ;;  %v185_v36 = vadd.f32 %v184_v24, %v183_v15  ;;  %v208_v38 = vsel %vm81_vm1, %v4011_v18, 0.0 }
  0x23   :  { %v153_v27 = vadd.f32 %v152_v28, %v151_v17  ;;  %v177_v46 = vrot.slane %v176_v29, 2  ;;  %v194_v49 = vadd.f32 %v193_v30, %v192_v20  ;;  %v202_v50 = vrot.slane %v201_v31, 4 }
  0x24   :  { %v161_v53 = vrot.slane %v160_v33, 1  ;;  %v169_v54 = vadd.f32 %v168_v34, %v167_v23  ;;  %v186_v60 = vrot.slane %v185_v36, 2  ;;  %v209_v61 = vsel %vm81_vm1, %v4020_v26, 0.0 }
  0x25   :  { %v178_v1 = vadd.f32 %v177_v46, %v176_v29  ;;  %v195_v2 = vrot.slane %v194_v49, 2  ;;  %v203_v4 = vadd.f32 %v202_v50, %v201_v31  ;;  %v210_v5 = vadd.f32 %v209_v61, %v208_v38 }
  0x26   :  { %v162_v6 = vadd.f32 %v161_v53, %v160_v33  ;;  %v170_v7 = vrot.slane %v169_v54, 1  ;;  %v187_v8 = vadd.f32 %v186_v60, %v185_v36  ;;  %v217_v10 = vsel %vm81_vm1, %v4027_v43, 0.0 }
  0x27   :  { %v179_v11 = vrot.slane %v178_v1, 1  ;;  %v196_v12 = vadd.f32 %v195_v2, %v194_v49  ;;  %v204_v13 = vrot.slane %v203_v4, 2  ;;  %v211_v14 = vrot.slane %v210_v5, 4 }
  0x28   :  { %v171_v15 = vadd.f32 %v170_v7, %v169_v54  ;;  %v188_v16 = vrot.slane %v187_v8, 1  ;;  %v218_v17 = vsel %vm81_vm1, %v4034_v63, 0.0  ;;  %v233_v19 = vmul.f32 0.0625, %v3976_v62 }
  0x29   :  { %v180_v20 = vadd.f32 %v179_v11, %v178_v1  ;;  %v197_v21 = vrot.slane %v196_v12, 1  ;;  %v205_v22 = vadd.f32 %v204_v13, %v203_v4  ;;  %v212_v23 = vadd.f32 %v211_v14, %v210_v5 }
  0x2a   :  { %v189_v24 = vadd.f32 %v188_v16, %v187_v8  ;;  %v219_v25 = vadd.f32 %v218_v17, %v217_v10  ;;  %v234_v28 = vmul.f32 0.0625, %v153_v27  ;;  %v235_v29 = vmul.f32 0.0625, %v162_v6 }
  0x2b   :  { %v198_v30 = vadd.f32 %v197_v21, %v196_v12  ;;  %v206_v31 = vrot.slane %v205_v22, 1  ;;  %v213_v33 = vrot.slane %v212_v23, 2  ;;  %v236_v34 = vmul.f32 0.0625, %v171_v15 }
  0x2c   :  { %v220_v36 = vrot.slane %v219_v25, 4  ;;  %v237_v38 = vmul.f32 0.0625, %v180_v20  ;;  %v238_v46 = vmul.f32 0.0625, %v189_v24  ;;  %v478_v49 = vpack.c.bf16 %v233_v19, %v233_v19 }
  0x2d   :  { %v207_v50 = vadd.f32 %v206_v31, %v205_v22  ;;  %v214_v53 = vadd.f32 %v213_v33, %v212_v23  ;;  %v239_v54 = vmul.f32 0.0625, %v198_v30  ;;  %v479_v62 = vpack.c.bf16 %v234_v28, %v234_v28 }
  0x2e   :  { %v221_v60 = vadd.f32 %v220_v36, %v219_v25  ;;  %v480_v61 = vpack.c.bf16 %v235_v29, %v235_v29  ;;  %v481_v1 = vpack.c.bf16 %v236_v34, %v236_v34  ;;  %v482_v2 = vpack.c.bf16 %v237_v38, %v237_v38 }
  0x2f   :  { %v215_v4 = vrot.slane %v214_v53, 1  ;;  %v240_v5 = vmul.f32 0.0625, %v207_v50  ;;  %v483_v27 = vpack.c.bf16 %v238_v46, %v238_v46  ;;  %v484_v6 = vpack.c.bf16 %v239_v54, %v239_v54 }
  0x30   :  { %v508_v7 = vunpack.c.l.b16 %v476_v55  ;;  %v222_v8 = vrot.slane %v221_v60, 2  ;;  %v509_v10 = vunpack.c.l.b16 %v477_v56  ;;  %v510_v11 = vunpack.c.l.b16 %v478_v49 }
  0x31   :  { %v216_v12 = vadd.f32 %v215_v4, %v214_v53  ;;  %v485_v13 = vpack.c.bf16 %v240_v5, %v240_v5  ;;  %v511_v14 = vunpack.c.l.b16 %v479_v62  ;;  %v512_v15 = vunpack.c.l.b16 %v480_v61 }
  0x32   :  { %v223_v16 = vadd.f32 %v222_v8, %v221_v60  ;;  %v513_v17 = vunpack.c.l.b16 %v481_v1  ;;  %v514_v19 = vunpack.c.l.b16 %v482_v2  ;;  %v515_v20 = vunpack.c.l.b16 %v483_v27 }
  0x33   :  { %v241_v21 = vmul.f32 0.0625, %v216_v12  ;;  %v516_v22 = vunpack.c.l.b16 %v484_v6  ;;  %vm520_vm4 = vcmask 1041409   ;;  %vm522_vm5 = vcmask 1042434  }
  0x34   :  { %v224_v37 = vrot.slane %v223_v16, 1  ;;  %v521_v55 = vsel %vm520_vm4, %v3919_v41, %v3901_v35  ;;  %vm524_vm6 = vcmask 1043459   ;;  %vm526_vm7 = vcmask 1044484  }
  0x35   :  { %v486_v45 = vpack.c.bf16 %v241_v21, %v241_v21  ;;  %v517_v56 = vunpack.c.l.b16 %v485_v13  ;;  %v523_v23 = vsel %vm522_vm5, %v3921_v42, %v521_v55  ;;  %vm528_vm8 = vcmask 1045509  }
  0x36   :  { %v225_v24 = vadd.f32 %v224_v37, %v223_v16  ;;  %v525_v25 = vsel %vm524_vm6, %v3929_v44, %v523_v23  ;;  %vm530_vm9 = vcmask 1046534   ;;  %v534_v28 = vsel %vm520_vm4, %v513_v17, %v512_v15 }
  0x37   :  { %v518_v29 = vunpack.c.l.b16 %v486_v45  ;;  %v527_v30 = vsel %vm526_vm7, %v508_v7, %v525_v25  ;;  %v535_v31 = vsel %vm522_vm5, %v514_v19, %v534_v28  ;;  %v251_v35 = vpack.c.bf16 %v3917_v40, %v3912_v39 }
  0x38   :  { %v242_v41 = vmul.f32 0.0625, %v225_v24  ;;  %v529_v33 = vsel %vm528_vm8, %v509_v10, %v527_v30  ;;  %v536_v34 = vsel %vm524_vm6, %v515_v20, %v535_v31  ;;  %v252_v42 = vpack.c.bf16 %v3938_v47, %v3927_v32 }
  0x39   :  { %v531_v36 = vsel %vm530_vm9, %v510_v11, %v529_v33  ;;  %vm532_vm10 = vcmask 1047559   ;;  %v537_v44 = vsel %vm526_vm7, %v516_v22, %v536_v34  ;;  %3288 = vmatprep.mubr.msk.bf16.mxu0 %vm81_vm1, %v251_v35  ;;  %v253_v38 = vpack.c.bf16 %v3949_v51, %v3943_v48 }
  0x3a   :  { %v487_v46 = vpack.c.bf16 %v242_v41, %v242_v41  ;;  %v538_v39 = vsel %vm528_vm8, %v517_v56, %v537_v44  ;;  %3289 = vmatmul.mubr.msk.bf16.gmra.mrb[16].mxu0 %vm81_vm1, %v252_v42  ;;  %v533_v47 = vsel %vm532_vm10, %v511_v14, %v531_v36  ;;  %v254_v50 = vpack.c.bf16 %v3967_v57, %v3954_v52  ;;  %v3493_v57 = vld [vmem:[%s4996_s4] sm:$0xff]  }
  0x3b   :  { %v539_v40 = vsel %vm530_vm9, %v518_v29, %v538_v39  ;;  %3292 = vmatprep.mubr.msk.bf16.mxu0 %vm81_vm1, %v253_v38  ;;  %v255_v54 = vpack.c.bf16 %v3981_v0, %v3972_v58  ;;  %v256_v48 = vpack.c.bf16 %v3999_v9, %v3990_v3  ;;  %v257_v51 = vpack.c.bf16 %v4020_v26, %v4011_v18  ;;  %v3494_v58 = vld [vmem:[%s4996_s4 + $0x8] sm:$0xff]   ;;  %v4097_v3 = vld [vmem:[#allocation2] sm:$0xff]  ;;  %v4104_v26 = vld [vmem:[#allocation2 + $0x10] sm:$0xff]  ;;  %s3723_s4 = smov 32  }
  0x3c   :  { %v519_v32 = vunpack.c.l.b16 %v487_v46  ;;  %v258_v52 = vpack.c.bf16 %v4034_v63, %v4027_v43  ;;  %3310 = vmatprep.subr.bf16.mxu1 %v3493_v57  ;;  %v4094_v0 = vld [vmem:[%s4997_s5 + $0x8] sm:$0xff]   ;;  %v4106_v43 = vld [vmem:[#allocation2 + $0x18] sm:$0xff]  ;;  %1233 = vrot.lane.b32.xlu0 %v4097_v3, %s3723_s4  ;;  %v3724_v15 = vmov 1966171168   ;;  %v595_v17 = vlaneseq }
  0x3d   :  { %3348 = vmatprep.subr.bf16.mxu0 %v4094_v0  ;;  %v4099_v9 = vld [vmem:[#allocation2 + $0x8] sm:$0xff]  ;;  %v1133_v63 = vpack.c.bf16 %v4106_v43, %v4104_v26  ;;  %1237 = vrot.lane.b32.xlu1 %v4104_v26, %s3723_s4  ;;  %v593_v16 = vunpack.c.l.s4 %v3724_v15 }
  0x3e   :  { %v540_v49 = vsel %vm532_vm10, %v519_v32, %v539_v40  ;;  %3349 = vmatpush3.bf16.msra.mxu0 %v4094_v0  ;;  %v1132_v18 = vpack.c.bf16 %v4099_v9, %v4097_v3  ;;  %v596_v20 = vshrl.u32 %v595_v17, 7 }
  0x3f   :  { %v541_v53 = vpack.c.b16 %v540_v49, %v533_v47  ;;  %v594_v19 = vunpack.c.0.s8 %v593_v16 }
  0x40   :  { %1235 = vrot.lane.b32.xlu0 %v4099_v9, %s3723_s4  ;;  %v4153_v25 = vsub.s32 0, %v596_v20 }
  0x41   :  { %3307 = vmatmul.mubr.msk.bf16.vlgmr.msra.gmra.mrb[0].mxu1 %vm81_vm1, %v541_v53  ;;  %1239 = vrot.lane.b32.xlu1 %v4106_v43, %s3723_s4  ;;  %v4150_v45 = vsub.s32 %v594_v19, %v596_v20 }
  0x42   :  { %3293 = vmatmul.mubr.msk.bf16.gmra.mrb[20].mxu0 %vm81_vm1, %v254_v50  ;;  %3311 = vmatpush3.bf16.msra.mxu1 %v3493_v57 }
  0x43   :  { %3296 = vmatprep.mubr.msk.bf16.mxu0 %vm81_vm1, %v255_v54  ;;  %3312 = vmatprep.subr.bf16.mxu1 %v3494_v58  ;;  %v4178_v54 = vld [vmem:[%s4995_s3] ss:$0 sm:$0xff] }
  0x46   :  { %3313 = vmatpush3.bf16.msra.mxu1 %v3494_v58 }
  0x47   :  { %3362 = vmatprep.subr.bf16.mxu1 %v3874_v59 }
  0x4a   :  { %3297 = vmatmul.mubr.msk.bf16.gmra.mrb[24].mxu0 %vm81_vm1, %v256_v48 }
  0x4b   :  { %3300 = vmatprep.mubr.msk.bf16.mxu0 %vm81_vm1, %v257_v51 }
  0x52   :  { %3301 = vmatmul.mubr.msk.bf16.gmra.mrb[28].mxu0 %vm81_vm1, %v258_v52 }
  0x53   :  { %3350 = vmatprep.mubr.msk.bf16.mxu0 %vm41_vm2, %v1132_v18 }
  0x5a   :  { %3351 = vmatmul.mubr.msk.bf16.vlgmr.msra.gmra.mrb[32].mxu0 %vm41_vm2, %v1133_v63 }
  0xd9   :  { %v4112_v62 = vpop.f32.mrb[0].mxu0 }
  0xda   :  { %v345_v60 = vpop.f32.mrb[1].mxu0 }
  0xdb   :  { %v4114_v61 = vpop.f32.mrb[2].mxu0 }
  0xdc   :  { %v348_v1 = vpop.f32.mrb[3].mxu0 }
  0xe1   :  { %v4116_v2 = vpop.f32.mrb[4].mxu0 }
  0xe2   :  { %v361_v4 = vpop.f32.mrb[5].mxu0 }
  0xe3   :  { %v4118_v5 = vpop.f32.mrb[6].mxu0 }
  0xe4   :  { %v364_v27 = vpop.f32.mrb[7].mxu0 }
  0xe9   :  { %v4120_v6 = vpop.f32.mrb[8].mxu0 }
  0xea   :  { %v377_v7 = vpop.f32.mrb[9].mxu0 }
  0xeb   :  { %v4126_v8 = vpop.f32.mrb[10].mxu0 }
  0xec   :  { %v4128_v10 = vpop.f32.mrb[11].mxu0 }
  0xf1   :  { %v4134_v11 = vpop.f32.mrb[12].mxu0 }
  0xf2   :  { %v4136_v12 = vpop.f32.mrb[13].mxu0 }
  0xf3   :  { %v4138_v13 = vpop.f32.mrb[14].mxu0 }
  0xf4   :  { %v4140_v14 = vpop.f32.mrb[15].mxu0 }
 0x10d   :  { %v4142_v21 = vpop.f32.mrb[16].mxu0 }
 0x10e   :  { %v4144_v22 = vpop.f32.mrb[17].mxu0 }
 0x10f   :  { %v4146_v37 = vpop.f32.mrb[18].mxu0 }
 0x110   :  { %v4148_v55 = vpop.f32.mrb[19].mxu0 }
 0x114   :  { %v582_v56 = vpop.f32.mrb[0].mxu1 }
 0x115   :  { %v591_v23 = vcombine.high %v582_v56, %v582_v56  ;;  %v598_v24 = vrot.slane %v582_v56, %v4150_v45  ;;  %v3308_v28 = vpop.f32.mrb[1].mxu1  ;;  %v4155_v29 = vpop.f32.mrb[20].mxu0 }
 0x116   :  { %v585_v30 = vpop.f32.mrb[2].mxu1  ;;  %v4157_v31 = vpop.f32.mrb[21].mxu0 }
 0x117   :  { %v605_v35 = vrot.slane %v591_v23, %v4150_v45  ;;  %v606_v41 = vcombine.high %v598_v24, %v598_v24  ;;  %v614_v33 = vrot.slane %v598_v24, %v4150_v45  ;;  %v640_v34 = vcombine.high %v585_v30, %v585_v30  ;;  %v3309_v42 = vpop.f32.mrb[3].mxu1  ;;  %v4161_v36 = vpop.f32.mrb[22].mxu0 }
 0x118   :  { %v647_v44 = vrot.slane %v585_v30, %v4150_v45  ;;  %v4164_v38 = vpop.f32.mrb[23].mxu0 }
 0x119   :  { %v607_v46 = vcombine.high %v605_v35, %v605_v35  ;;  %v628_v39 = vrot.slane %v606_v41, %v4150_v45  ;;  %v636_v40 = vcombine.high %v614_v33, %v614_v33  ;;  %v692_v32 = vrot.slane %v614_v33, %v4153_v25 }
 0x11a   :  { %v621_v47 = vrot.slane %v605_v35, %v4150_v45  ;;  %v4170_v49 = vrot.slane %v640_v34, %v4150_v45  ;;  %v655_v50 = vcombine.high %v647_v44, %v647_v44  ;;  %v4173_v53 = vrot.slane %v647_v44, %v4150_v45 }
 0x11b   :  { %v638_v48 = vcombine.high %v628_v39, %v628_v39  ;;  %v696_v51 = vrot.slane %v628_v39, %v4153_v25  ;;  %v700_v52 = vrot.slane %v636_v40, %v4153_v25  ;;  %v769_v57 = vadd.f32 %v692_v32, %v345_v60 }
 0x11c   :  { %v770_v58 = vadd.f32 %v692_v32, %v348_v1  ;;  %v708_v18 = vrot.slane %v621_v47, %v4153_v25  ;;  %v635_v63 = vrot.slane %v607_v46, %v4150_v45  ;;  %v656_v15 = vcombine.high %v4170_v49, %v4170_v49 }
 0x11d   :  { %v704_v16 = vrot.slane %v638_v48, %v4153_v25  ;;  %v771_v17 = vadd.f32 %v4112_v62, %v696_v51  ;;  %v772_v19 = vadd.f32 %v4114_v61, %v696_v51  ;;  %v4189_v20 = vadd.f32 %v700_v52, %v361_v4  ;;  %v4191_v56 = vpop.f32.mrb[24].mxu0 }
 0x11e   :  { %v4193_v23 = vadd.f32 %v700_v52, %v364_v27  ;;  %v4196_v60 = vadd.f32 %v4178_v54, %v769_v57  ;;  %v4199_v1 = vadd.f32 %v4178_v54, %v770_v58  ;;  %v777_v24 = vadd.f32 %v708_v18, %v377_v7  ;;  %v4201_v28 = vpop.f32.mrb[25].mxu0 }
 0x11f   :  { %v4204_v30 = vadd.f32 %v4116_v2, %v704_v16  ;;  %v4207_v62 = vadd.f32 %v4118_v5, %v704_v16  ;;  %v4210_v61 = vadd.f32 %v4178_v54, %v771_v17  ;;  %v810_v4 = vadd.f32 %v4178_v54, %v772_v19  ;;  %v4213_v27 = vpop.f32.mrb[26].mxu0 }
 0x120   :  { %v778_v35 = vadd.f32 %v708_v18, %v4128_v10  ;;  %v815_v41 = vadd.f32 %v4178_v54, %v777_v24  ;;  %v639_v7 = vcombine.high %v635_v63, %v635_v63  ;;  %v712_v33 = vrot.slane %v635_v63, %v4153_v25  ;;  %v4218_v34 = vpop.f32.mrb[27].mxu0 }
 0x121   :  { %v841_v2 = vmax.f32 %v4210_v61, 0.0  ;;  %v842_v5 = vmax.f32 %v810_v4, 0.0  ;;  %v637_v42 = vcombine.high %v621_v47, %v621_v47  ;;  %v677_v44 = vrot.slane %v655_v50, %v4150_v45 }
 0x122   :  { %v816_v46 = vadd.f32 %v4178_v54, %v778_v35  ;;  %v847_v39 = vmax.f32 %v815_v41, 0.0  ;;  %v720_v40 = vrot.slane %v639_v7, %v4153_v25  ;;  %v4225_v10 = vadd.f32 %v4120_v6, %v712_v33 }
 0x123   :  { %v4228_v32 = vadd.f32 %v4126_v8, %v712_v33  ;;  %v716_v48 = vrot.slane %v637_v42, %v4153_v25  ;;  %v728_v51 = vrot.slane %v677_v44, %v4153_v25  ;;  %v724_v47 = vrot.slane %v4173_v53, %v4153_v25 }
 0x124   :  { %v848_v52 = vmax.f32 %v816_v46, 0.0  ;;  %v783_v50 = vadd.f32 %v4134_v11, %v720_v40  ;;  %v784_v57 = vadd.f32 %v4138_v13, %v720_v40  ;;  %v687_v58 = vcombine.high %v677_v44, %v677_v44 }
 0x125   :  { %v781_v18 = vadd.f32 %v716_v48, %v4136_v12  ;;  %v782_v6 = vadd.f32 %v716_v48, %v4140_v14  ;;  %v787_v8 = vadd.f32 %v4142_v21, %v728_v51  ;;  %v785_v63 = vadd.f32 %v724_v47, %v4144_v22  ;;  %v4240_v16 = vpop.f32.mrb[28].mxu0 }
 0x126   :  { %v4242_v17 = vpack.c.bf16 %v848_v52, %v847_v39  ;;  %v821_v19 = vadd.f32 %v4178_v54, %v783_v50  ;;  %v822_v24 = vadd.f32 %v4178_v54, %v784_v57  ;;  %v788_v11 = vadd.f32 %v4146_v37, %v728_v51  ;;  %v4247_v13 = vpop.f32.mrb[29].mxu0 }
 0x127   :  { %v819_v12 = vadd.f32 %v4178_v54, %v781_v18  ;;  %v820_v14 = vadd.f32 %v4178_v54, %v782_v6  ;;  %v825_v21 = vadd.f32 %v4178_v54, %v787_v8  ;;  %v823_v22 = vadd.f32 %v4178_v54, %v785_v63  ;;  %v4253_v61 = vpop.f32.mrb[30].mxu0 }
 0x128   :  { %v853_v4 = vmax.f32 %v821_v19, 0.0  ;;  %v854_v35 = vmax.f32 %v822_v24, 0.0  ;;  %v826_v41 = vadd.f32 %v4178_v54, %v788_v11  ;;  %v786_v7 = vadd.f32 %v724_v47, %v4148_v55  ;;  %v4257_v33 = vpop.f32.mrb[31].mxu0 }
 0x129   :  { %v851_v37 = vmax.f32 %v819_v12, 0.0  ;;  %v852_v42 = vmax.f32 %v820_v14, 0.0  ;;  %v857_v44 = vmax.f32 %v825_v21, 0.0  ;;  %v855_v46 = vmax.f32 %v823_v22, 0.0 }
 0x12a   :  { %v4259_v39 = vpack.c.bf16 %v854_v35, %v853_v4  ;;  %v858_v40 = vmax.f32 %v826_v41, 0.0  ;;  %v824_v48 = vadd.f32 %v4178_v54, %v786_v7  ;;  %v736_v51 = vrot.slane %v687_v58, %v4153_v25 }
 0x12b   :  { %v4263_v52 = vpack.c.bf16 %v852_v42, %v851_v37  ;;  %v685_v50 = vcombine.high %v4173_v53, %v4173_v53  ;;  %v839_v55 = vmax.f32 %v4196_v60, 0.0  ;;  %v840_v47 = vmax.f32 %v4199_v1, 0.0 }
 0x12c   :  { %v4269_v57 = vpack.c.bf16 %v858_v40, %v857_v44  ;;  %v856_v18 = vmax.f32 %v824_v48, 0.0  ;;  %v791_v6 = vadd.f32 %v4155_v29, %v736_v51  ;;  %v792_v8 = vadd.f32 %v4161_v36, %v736_v51 }
 0x12d   :  { %v732_v63 = vrot.slane %v685_v50, %v4153_v25  ;;  %v871_v19 = vpack.c.bf16 %v840_v47, %v839_v55  ;;  %v872_v58 = vpack.c.bf16 %v842_v5, %v841_v2  ;;  %v811_v24 = vadd.f32 %v4178_v54, %v4189_v20 }
 0x12e   :  { %v4276_v11 = vpack.c.bf16 %v856_v18, %v855_v46  ;;  %v829_v53 = vadd.f32 %v4178_v54, %v791_v6  ;;  %v830_v60 = vadd.f32 %v4178_v54, %v792_v8  ;;  %v812_v1 = vadd.f32 %v4178_v54, %v4193_v23 }
 0x12f   :  { %v789_v29 = vadd.f32 %v732_v63, %v4157_v31  ;;  %3314 = vmatprep.mubr.msk.bf16.mxu1 %vm41_vm2, %v871_v19  ;;  %v790_v36 = vadd.f32 %v732_v63, %v4164_v38  ;;  %v843_v12 = vmax.f32 %v811_v24, 0.0  ;;  %v684_v20 = vrot.slane %v656_v15, %v4150_v45 }
 0x130   :  { %v861_v2 = vmax.f32 %v829_v53, 0.0  ;;  %v862_v5 = vmax.f32 %v830_v60, 0.0  ;;  %3315 = vmatmul.mubr.msk.bf16.vlgmr.msra.gmra.mrb[4].mxu1 %vm41_vm2, %v872_v58  ;;  %v844_v14 = vmax.f32 %v812_v1, 0.0  ;;  %v670_v23 = vrot.slane %v4170_v49, %v4150_v45 }
 0x131   :  { %v827_v31 = vadd.f32 %v4178_v54, %v789_v29  ;;  %v828_v21 = vadd.f32 %v4178_v54, %v790_v36  ;;  %v744_v38 = vrot.slane %v684_v20, %v4153_v25  ;;  %v813_v22 = vadd.f32 %v4178_v54, %v4204_v30  ;;  %3363 = vmatpush3.bf16.msra.mxu1 %v3874_v59 }
 0x132   :  { %v882_v15 = vpack.c.bf16 %v862_v5, %v861_v2  ;;  %v873_v4 = vpack.c.bf16 %v844_v14, %v843_v12  ;;  %v740_v35 = vrot.slane %v670_v23, %v4153_v25  ;;  %v814_v41 = vadd.f32 %v4178_v54, %v4207_v62  ;;  %3364 = vmatprep.subr.bf16.mxu1 %v4094_v0 }
 0x133   :  { %v859_v45 = vmax.f32 %v827_v31, 0.0  ;;  %v860_v49 = vmax.f32 %v828_v21, 0.0  ;;  %v795_v7 = vadd.f32 %v4191_v56, %v744_v38  ;;  %v796_v37 = vadd.f32 %v4213_v27, %v744_v38 }
 0x134   :  { %3318 = vmatprep.mubr.msk.bf16.mxu1 %vm41_vm2, %v873_v4  ;;  %v793_v30 = vadd.f32 %v740_v35, %v4201_v28  ;;  %v794_v42 = vadd.f32 %v740_v35, %v4218_v34  ;;  %v845_v44 = vmax.f32 %v813_v22, 0.0  ;;  %v846_v46 = vmax.f32 %v814_v41, 0.0 }
 0x135   :  { %v881_v40 = vpack.c.bf16 %v860_v49, %v859_v45  ;;  %v833_v48 = vadd.f32 %v4178_v54, %v795_v7  ;;  %v834_v62 = vadd.f32 %v4178_v54, %v796_v37  ;;  %v688_v51 = vcombine.high %v684_v20, %v684_v20  ;;  %3365 = vmatpush3.bf16.msra.mxu1 %v4094_v0 }
 0x136   :  { %v831_v56 = vadd.f32 %v4178_v54, %v793_v30  ;;  %v832_v27 = vadd.f32 %v4178_v54, %v794_v42  ;;  %v874_v50 = vpack.c.bf16 %v846_v46, %v845_v44  ;;  %v686_v55 = vcombine.high %v670_v23, %v670_v23  ;;  %3378 = vmatprep.subr.bf16.mxu1 %v3874_v59 }
 0x137   :  { %v865_v28 = vmax.f32 %v833_v48, 0.0  ;;  %v866_v34 = vmax.f32 %v834_v62, 0.0  ;;  %v752_v47 = vrot.slane %v688_v51, %v4153_v25  ;;  %v817_v18 = vadd.f32 %v4178_v54, %v4225_v10 }
 0x138   :  { %v863_v6 = vmax.f32 %v831_v56, 0.0  ;;  %v864_v8 = vmax.f32 %v832_v27, 0.0  ;;  %3319 = vmatmul.mubr.msk.bf16.gmra.mrb[8].mxu1 %vm41_vm2, %v874_v50  ;;  %v748_v63 = vrot.slane %v686_v55, %v4153_v25  ;;  %v818_v19 = vadd.f32 %v4178_v54, %v4228_v32 }
 0x139   :  { %v884_v58 = vpack.c.bf16 %v866_v34, %v865_v28  ;;  %3322 = vmatprep.mubr.msk.bf16.mxu1 %vm41_vm2, %v4242_v17  ;;  %v799_v59 = vadd.f32 %v4240_v16, %v752_v47  ;;  %v800_v24 = vadd.f32 %v4253_v61, %v752_v47  ;;  %v849_v53 = vmax.f32 %v817_v18, 0.0 }
 0x13a   :  { %v883_v60 = vpack.c.bf16 %v864_v8, %v863_v6  ;;  %v797_v10 = vadd.f32 %v748_v63, %v4247_v13  ;;  %v798_v1 = vadd.f32 %v748_v63, %v4257_v33  ;;  %v850_v29 = vmax.f32 %v818_v19, 0.0 }
 0x13b   :  { %v837_v25 = vadd.f32 %v4178_v54, %v799_v59  ;;  %v838_v36 = vadd.f32 %v4178_v54, %v800_v24  ;;  %v4398_v59 = vld [vmem:[%s4998_s6] sm:$0xff]   ;;  %v4403_v24 = vld [vmem:[%s4998_s6 + $0x8] sm:$0xff]  }
 0x13c   :  { %v835_v32 = vadd.f32 %v4178_v54, %v797_v10  ;;  %v836_v12 = vadd.f32 %v4178_v54, %v798_v1  ;;  %v876_v17 = vpack.c.bf16 %v850_v29, %v849_v53  ;;  %v4345_v54 = vpop.f32.mrb[32].mxu0  ;;  %3354 = vmatprep.subr.bf16.mxu0 %v4398_v59 }
 0x13d   :  { %v869_v20 = vmax.f32 %v837_v25, 0.0  ;;  %v870_v16 = vmax.f32 %v838_v36, 0.0  ;;  %v1186_v13 = vpop.f32.mrb[33].mxu0  ;;  %3355 = vmatpush3.bf16.msra.mxu0 %v4398_v59 }
 0x13e   :  { %v867_v2 = vmax.f32 %v835_v32, 0.0  ;;  %v868_v61 = vmax.f32 %v836_v12, 0.0  ;;  %v4347_v33 = vpop.f32.mrb[34].mxu0  ;;  %3356 = vmatprep.subr.bf16.mxu0 %v4403_v24 }
 0x13f   :  { %v886_v5 = vpack.c.bf16 %v870_v16, %v869_v20 }
 0x140   :  { %v885_v14 = vpack.c.bf16 %v868_v61, %v867_v2  ;;  %3323 = vmatmul.mubr.msk.bf16.gmra.mrb[12].mxu1 %vm41_vm2, %v876_v17 }
 0x141   :  { %3326 = vmatprep.mubr.msk.bf16.mxu1 %vm41_vm2, %v4263_v52  ;;  %v4352_v52 = vld [vmem:[%s4999_s7] ss:$0 sm:$0xff]  ;;  %3357 = vmatpush3.bf16.msra.mxu0 %v4403_v24 }
 0x142   :  { %3370 = vmatprep.subr.bf16.mxu0 %v4398_v59 }
 0x148   :  { %3327 = vmatmul.mubr.msk.bf16.gmra.mrb[16].mxu1 %vm41_vm2, %v4259_v39  ;;  %v1189_v39 = vpop.f32.mrb[35].mxu0 }
 0x149   :  { %3330 = vmatprep.mubr.msk.bf16.mxu1 %vm41_vm2, %v4276_v11 }
 0x150   :  { %3331 = vmatmul.mubr.msk.bf16.gmra.mrb[20].mxu1 %vm41_vm2, %v4269_v57 }
 0x151   :  { %3334 = vmatprep.mubr.msk.bf16.mxu1 %vm41_vm2, %v881_v40 }
 0x158   :  { %3335 = vmatmul.mubr.msk.bf16.gmra.mrb[24].mxu1 %vm41_vm2, %v882_v15 }
 0x159   :  { %3338 = vmatprep.mubr.msk.bf16.mxu1 %vm41_vm2, %v883_v60 }
 0x160   :  { %3339 = vmatmul.mubr.msk.bf16.gmra.mrb[28].mxu1 %vm41_vm2, %v884_v58  ;;  %v1234_v58 = vpop.permute.xlu0 %1233 }
 0x161   :  { %3342 = vmatprep.mubr.msk.bf16.mxu1 %vm41_vm2, %v885_v14 }
 0x164   :  { %v1236_v36 = vpop.permute.xlu0 %1235 }
 0x168   :  { %3343 = vmatmul.mubr.msk.bf16.gmra.mrb[32].mxu1 %vm41_vm2, %v886_v5 }
 0x203   :  { %v3316_v57 = vpop.f32.mrb[4].mxu1 }
 0x204   :  { %v4355_v11 = vadd.f32 %v3316_v57, %v4352_v52  ;;  %v993_v23 = vpop.f32.mrb[5].mxu1 }
 0x205   :  { %v4358_v31 = vadd.f32 %v4352_v52, %v993_v23  ;;  %v3317_v21 = vpop.f32.mrb[6].mxu1 }
 0x206   :  { %v4361_v38 = vadd.f32 %v3317_v21, %v4352_v52  ;;  %v996_v22 = vpop.f32.mrb[7].mxu1 }
 0x207   :  { %v4364_v15 = vadd.f32 %v4352_v52, %v996_v22  ;;  %v1201_v4 = vadd.f32 %v1186_v13, %v4358_v31 }
 0x209   :  { %v3096_v35 = vmul.f32 -1.442695, %v1201_v4  ;;  %v1202_v41 = vadd.f32 %v1189_v39, %v4364_v15 }
 0x20b   :  { %3500 = vpow2.f32 %v3096_v35  ;;  %v3097_v45 = vmul.f32 -1.442695, %v1202_v41  ;;  %v3320_v49 = vpop.f32.mrb[8].mxu1 }
 0x20c   :  { %v4369_v7 = vadd.f32 %v3320_v49, %v4352_v52  ;;  %v1009_v37 = vpop.f32.mrb[9].mxu1 }
 0x20d   :  { %3502 = vpow2.f32 %v3097_v45  ;;  %v4372_v30 = vadd.f32 %v4352_v52, %v1009_v37  ;;  %v3321_v42 = vpop.f32.mrb[10].mxu1 }
 0x20e   :  { %v4375_v44 = vadd.f32 %v3321_v42, %v4352_v52  ;;  %v1012_v46 = vpop.f32.mrb[11].mxu1 }
 0x20f   :  { %v4378_v40 = vadd.f32 %v4352_v52, %v1012_v46 }
 0x213   :  { %v3324_v48 = vpop.f32.mrb[12].mxu1 }
 0x214   :  { %v4381_v62 = vadd.f32 %v3324_v48, %v4352_v52  ;;  %v1025_v51 = vpop.f32.mrb[13].mxu1 }
 0x215   :  { %v3501_v56 = vpop.eup %3500  ;;  %v4384_v27 = vadd.f32 %v4352_v52, %v1025_v51  ;;  %v3325_v50 = vpop.f32.mrb[14].mxu1 }
 0x216   :  { %v1217_v55 = vadd.f32 1.0, %v3501_v56  ;;  %v4387_v28 = vadd.f32 %v3325_v50, %v4352_v52  ;;  %v1028_v34 = vpop.f32.mrb[15].mxu1 }
 0x217   :  { %v3503_v47 = vpop.eup %3502  ;;  %v4390_v18 = vadd.f32 %v4352_v52, %v1028_v34 }
 0x218   :  { %3504 = vrcp.f32 %v1217_v55  ;;  %v1218_v6 = vadd.f32 1.0, %v3503_v47 }
 0x21a   :  { %3506 = vrcp.f32 %v1218_v6 }
 0x21b   :  { %v3328_v8 = vpop.f32.mrb[16].mxu1 }
 0x21c   :  { %v4393_v63 = vadd.f32 %v3328_v8, %v4352_v52  ;;  %v1041_v19 = vpop.f32.mrb[17].mxu1 }
 0x21d   :  { %v4406_v53 = vadd.f32 %v4352_v52, %v1041_v19  ;;  %v3329_v60 = vpop.f32.mrb[18].mxu1 }
 0x21e   :  { %v4409_v10 = vadd.f32 %v3329_v60, %v4352_v52  ;;  %v1044_v1 = vpop.f32.mrb[19].mxu1 }
 0x21f   :  { %v4413_v29 = vadd.f32 %v4352_v52, %v1044_v1 }
 0x222   :  { %v4417_v25 = vpop.eup %3504 }
 0x223   :  { %v3332_v32 = vpop.f32.mrb[20].mxu1  ;;  %v1245_v16 = vmul.f32 %v4417_v25, %v1234_v58 }
 0x224   :  { %v4420_v12 = vpop.eup %3506  ;;  %v4423_v17 = vadd.f32 %v3332_v32, %v4352_v52  ;;  %v1057_v20 = vpop.f32.mrb[21].mxu1 }
 0x225   :  { %v4428_v2 = vadd.f32 %v4352_v52, %v1057_v20  ;;  %v1246_v61 = vmul.f32 %v4420_v12, %v1236_v36  ;;  %v3333_v5 = vpop.f32.mrb[22].mxu1  ;;  %v1238_v32 = vpop.permute.xlu1 %1237 }
 0x226   :  { %v4432_v14 = vadd.f32 %v3333_v5, %v4352_v52  ;;  %v1060_v13 = vpop.f32.mrb[23].mxu1 }
 0x227   :  { %v1203_v39 = vadd.f32 %v4345_v54, %v4428_v2  ;;  %v1249_v57 = vpack.c.bf16 %v1246_v61, %v1245_v16  ;;  %v4437_v23 = vadd.f32 %v4352_v52, %v1060_v13 }
 0x229   :  { %v3098_v21 = vmul.f32 -1.442695, %v1203_v39  ;;  %v1204_v22 = vadd.f32 %v4347_v33, %v4437_v23  ;;  %1253 = vrot.lane.b32.xlu0 %v1249_v57, %s3725_s27  ;;  %v1240_v57 = vpop.permute.xlu1 %1239 }
 0x22b   :  { %3508 = vpow2.f32 %v3098_v21  ;;  %v3099_v4 = vmul.f32 -1.442695, %v1204_v22  ;;  %v3336_v35 = vpop.f32.mrb[24].mxu1 }
 0x22c   :  { %v4443_v41 = vadd.f32 %v3336_v35, %v4352_v52  ;;  %v1073_v45 = vpop.f32.mrb[25].mxu1 }
 0x22d   :  { %3510 = vpow2.f32 %v3099_v4  ;;  %v4446_v54 = vadd.f32 %v4352_v52, %v1073_v45  ;;  %v3337_v49 = vpop.f32.mrb[26].mxu1 }
 0x22e   :  { %v4449_v37 = vadd.f32 %v3337_v49, %v4352_v52  ;;  %v1076_v42 = vpop.f32.mrb[27].mxu1 }
 0x22f   :  { %v4452_v33 = vadd.f32 %v4352_v52, %v1076_v42 }
 0x233   :  { %v3340_v46 = vpop.f32.mrb[28].mxu1 }
 0x234   :  { %v4455_v48 = vadd.f32 %v3340_v46, %v4352_v52  ;;  %v1089_v51 = vpop.f32.mrb[29].mxu1 }
 0x235   :  { %v3509_v56 = vpop.eup %3508  ;;  %v4458_v50 = vadd.f32 %v4352_v52, %v1089_v51  ;;  %v3341_v55 = vpop.f32.mrb[30].mxu1 }
 0x236   :  { %v1219_v34 = vadd.f32 1.0, %v3509_v56  ;;  %v4461_v47 = vadd.f32 %v3341_v55, %v4352_v52  ;;  %v1092_v6 = vpop.f32.mrb[31].mxu1 }
 0x237   :  { %v3511_v8 = vpop.eup %3510  ;;  %v4464_v19 = vadd.f32 %v4352_v52, %v1092_v6 }
 0x238   :  { %3512 = vrcp.f32 %v1219_v34  ;;  %v1220_v58 = vadd.f32 1.0, %v3511_v8 }
 0x23a   :  { %3514 = vrcp.f32 %v1220_v58 }
 0x23b   :  { %v3344_v60 = vpop.f32.mrb[32].mxu1 }
 0x23c   :  { %v4467_v1 = vadd.f32 %v3344_v60, %v4352_v52  ;;  %v1105_v36 = vpop.f32.mrb[33].mxu1 }
 0x23d   :  { %v4470_v20 = vadd.f32 %v4352_v52, %v1105_v36  ;;  %v3345_v16 = vpop.f32.mrb[34].mxu1 }
 0x23e   :  { %v4473_v61 = vadd.f32 %v3345_v16, %v4352_v52  ;;  %v1108_v5 = vpop.f32.mrb[35].mxu1 }
 0x23f   :  { %v4476_v13 = vadd.f32 %v4352_v52, %v1108_v5 }
 0x242   :  { %v3513_v39 = vpop.eup %3512 }
 0x243   :  { %v1247_v22 = vmul.f32 %v3513_v39, %v1238_v32 }
 0x244   :  { %v3515_v21 = vpop.eup %3514 }
 0x245   :  { %v1248_v4 = vmul.f32 %v3515_v21, %v1240_v57  ;;  %v1348_v57 = vmul.f32 %v4417_v25, %v4097_v3  ;;  %v1355_v3 = vsub.f32 1.0, %v3515_v21 }
 0x247   :  { %v1250_v35 = vpack.c.bf16 %v1248_v4, %v1247_v22  ;;  %v1353_v22 = vsub.f32 1.0, %v4420_v12 }
 0x249   :  { %1255 = vrot.lane.b32.xlu1 %v1250_v35, %s3725_s27 }
 0x29b   :  { %v1254_v45 = vpop.permute.xlu0 %1253 }
 0x29c   :  { %3358 = vmatprep.mubr.msk.bf16.mxu0 %vm41_vm2, %v1254_v45  ;;  %v1349_v45 = vmul.f32 %v4420_v12, %v4099_v9 }
 0x2bb   :  { %v1256_v49 = vpop.permute.xlu1 %1255 }
 0x2bc   :  { %3359 = vmatmul.mubr.msk.bf16.vlgmr.msra.gmra.mrb[36].mxu0 %vm41_vm2, %v1256_v49 }
 0x2bd   :  { %3371 = vmatpush3.bf16.msra.mxu0 %v4398_v59 }
 0x2be   :  { %3372 = vmatprep.subr.bf16.mxu0 %v4403_v24 }
 0x2c1   :  { %3373 = vmatpush3.bf16.msra.mxu0 %v4403_v24 }
 0x2c2   :  { %3386 = vmatprep.subr.bf16.mxu0 %v4398_v59 }
 0x38f   :  { %v3360_v52 = vpop.f32.mrb[36].mxu0 }
 0x390   :  { %v1309_v42 = vpop.f32.mrb[37].mxu0 }
 0x391   :  { %1328 = vrot.lane.b32.xlu0 %v1309_v42, %s3726_s28  ;;  %v3361_v46 = vpop.f32.mrb[38].mxu0 }
 0x392   :  { %v1312_v51 = vpop.f32.mrb[39].mxu0 }
 0x393   :  { %1330 = vrot.lane.b32.xlu1 %v1312_v51, %s3726_s28  ;;  %v1350_v51 = vmul.f32 %v3513_v39, %v4104_v26 }
 0x395   :  { %1332 = vrot.lane.b32.xlu0 %v3360_v52, %s3726_s28  ;;  %v1354_v52 = vsub.f32 1.0, %v3513_v39 }
 0x397   :  { %1334 = vrot.lane.b32.xlu1 %v3361_v46, %s3726_s28 }
 0x403   :  { %v1329_v56 = vpop.permute.xlu0 %1328 }
 0x404   :  { %v1340_v55 = vadd.f32 %v1329_v56, %v4358_v31 }
 0x405   :  { %v1331_v34 = vpop.permute.xlu1 %1330 }
 0x406   :  { %3516 = vtanh.f32 %v1340_v55  ;;  %v1341_v6 = vadd.f32 %v1331_v34, %v4364_v15  ;;  %v1352_v15 = vsub.f32 1.0, %v4417_v25  ;;  %v1351_v34 = vmul.f32 %v3515_v21, %v4106_v43  ;;  %v4530_v43 = vld [vmem:[%s4997_s5] sm:$0xff]  }
 0x407   :  { %v1333_v8 = vpop.permute.xlu0 %1332 }
 0x408   :  { %3518 = vtanh.f32 %v1341_v6  ;;  %v1342_v58 = vadd.f32 %v1333_v8, %v4428_v2 }
 0x409   :  { %v1335_v60 = vpop.permute.xlu1 %1334 }
 0x40a   :  { %3520 = vtanh.f32 %v1342_v58  ;;  %v1343_v36 = vadd.f32 %v1335_v60, %v4437_v23 }
 0x40c   :  { %3522 = vtanh.f32 %v1343_v36 }
 0x410   :  { %v3517_v32 = vpop.eup %3516 }
 0x411   :  { %1360 = vrot.lane.b32.xlu0 %v3517_v32, %s3726_s28 }
 0x412   :  { %v3519_v16 = vpop.eup %3518 }
 0x413   :  { %1362 = vrot.lane.b32.xlu1 %v3519_v16, %s3726_s28 }
 0x414   :  { %v3521_v31 = vpop.eup %3520 }
 0x415   :  { %1364 = vrot.lane.b32.xlu0 %v3521_v31, %s3726_s28 }
 0x416   :  { %v3523_v5 = vpop.eup %3522 }
 0x417   :  { %1366 = vrot.lane.b32.xlu1 %v3523_v5, %s3726_s28 }
 0x483   :  { %v1361_v2 = vpop.permute.xlu0 %1360 }
 0x484   :  { %v1372_v23 = vmul.f32 %v1361_v2, %v1352_v15 }
 0x485   :  { %v1363_v4 = vpop.permute.xlu1 %1362 }
 0x486   :  { %v4501_v35 = vadd.f32 %v1372_v23, %v1348_v57  ;;  %v1373_v49 = vmul.f32 %v1363_v4, %v1353_v22 }
 0x487   :  { %v1365_v42 = vpop.permute.xlu0 %1364 }
 0x488   :  { %v4505_v46 = vadd.f32 %v1373_v49, %v1349_v45  ;;  %v1374_v56 = vmul.f32 %v1365_v42, %v1354_v52  ;;  %1469 = vrot.lane.b32.xlu0 %v4501_v35, %s3723_s4 }
 0x489   :  { %v1367_v25 = vpop.permute.xlu1 %1366 }
 0x48a   :  { %v4510_v55 = vadd.f32 %v1374_v56, %v1350_v51  ;;  %v1375_v6 = vmul.f32 %v1367_v25, %v1355_v3  ;;  %1471 = vrot.lane.b32.xlu1 %v4505_v46, %s3723_s4  ;;  %v1380_v9 = vpack.c.bf16 %v4505_v46, %v4501_v35 }
 0x48c   :  { %v4517_v12 = vadd.f32 %v1375_v6, %v1351_v34  ;;  %1473 = vrot.lane.b32.xlu0 %v4510_v55, %s3723_s4  ;;  %3366 = vmatprep.mubr.msk.bf16.mxu1 %vm41_vm2, %v1380_v9 }
 0x48e   :  { %v1381_v26 = vpack.c.bf16 %v4517_v12, %v4510_v55  ;;  %1475 = vrot.lane.b32.xlu1 %v4517_v12, %s3723_s4 }
 0x490   :  { %3367 = vmatmul.mubr.msk.bf16.vlgmr.msra.gmra.mrb[36].mxu1 %vm41_vm2, %v1381_v26 }
 0x491   :  { %3379 = vmatpush3.bf16.msra.mxu1 %v4530_v43 }
 0x492   :  { %3380 = vmatprep.subr.bf16.mxu1 %v4094_v0 }
 0x495   :  { %3381 = vmatpush3.bf16.msra.mxu1 %v4094_v0 }
 0x496   :  { %3394 = vmatprep.subr.bf16.mxu1 %v4530_v43 }
 0x4fa   :  { %v1470_v42 = vpop.permute.xlu0 %1469 }
 0x4fc   :  { %v1472_v51 = vpop.permute.xlu1 %1471 }
 0x4fe   :  { %v1474_v34 = vpop.permute.xlu0 %1473 }
 0x500   :  { %v1476_v6 = vpop.permute.xlu1 %1475 }
 0x563   :  { %v3368_v39 = vpop.f32.mrb[36].mxu1 }
 0x564   :  { %v1439_v21 = vadd.f32 %v3368_v39, %v4423_v17  ;;  %v1422_v8 = vpop.f32.mrb[37].mxu1 }
 0x565   :  { %v1437_v58 = vadd.f32 %v1422_v8, %v4355_v11  ;;  %v3369_v60 = vpop.f32.mrb[38].mxu1 }
 0x566   :  { %v3108_v36 = vmul.f32 -1.442695, %v1439_v21  ;;  %v1440_v32 = vadd.f32 %v3369_v60, %v4432_v14  ;;  %v1425_v16 = vpop.f32.mrb[39].mxu1 }
 0x567   :  { %v3106_v31 = vmul.f32 -1.442695, %v1437_v58  ;;  %v1438_v5 = vadd.f32 %v1425_v16, %v4361_v38 }
 0x568   :  { %3524 = vpow2.f32 %v3108_v36  ;;  %v3109_v15 = vmul.f32 -1.442695, %v1440_v32 }
 0x569   :  { %3526 = vpow2.f32 %v3106_v31  ;;  %v3107_v0 = vmul.f32 -1.442695, %v1438_v5 }
 0x56a   :  { %3528 = vpow2.f32 %v3109_v15 }
 0x56b   :  { %3530 = vpow2.f32 %v3107_v0 }
 0x572   :  { %v3525_v2 = vpop.eup %3524 }
 0x573   :  { %v3527_v57 = vpop.eup %3526  ;;  %v1455_v23 = vadd.f32 1.0, %v3525_v2 }
 0x574   :  { %v3529_v22 = vpop.eup %3528  ;;  %v1453_v4 = vadd.f32 1.0, %v3527_v57 }
 0x575   :  { %v3531_v45 = vpop.eup %3530  ;;  %3532 = vrcp.f32 %v1455_v23  ;;  %v1456_v49 = vadd.f32 1.0, %v3529_v22 }
 0x576   :  { %3534 = vrcp.f32 %v1453_v4  ;;  %v1454_v52 = vadd.f32 1.0, %v3531_v45 }
 0x577   :  { %3536 = vrcp.f32 %v1456_v49 }
 0x578   :  { %3538 = vrcp.f32 %v1454_v52 }
 0x57f   :  { %v4540_v56 = vpop.eup %3532 }
 0x580   :  { %v3535_v3 = vpop.eup %3534  ;;  %v1483_v26 = vmul.f32 %v4540_v56, %v1474_v34 }
 0x581   :  { %v4542_v25 = vpop.eup %3536  ;;  %v1481_v21 = vmul.f32 %v3535_v3, %v1470_v42 }
 0x582   :  { %v3539_v9 = vpop.eup %3538  ;;  %v1484_v39 = vmul.f32 %v4542_v25, %v1476_v6 }
 0x583   :  { %v1482_v8 = vmul.f32 %v3539_v9, %v1472_v51 }
 0x584   :  { %v1486_v58 = vpack.c.bf16 %v1484_v39, %v1483_v26  ;;  %v1577_v26 = vsub.f32 1.0, %v3539_v9 }
 0x585   :  { %v1485_v60 = vpack.c.bf16 %v1482_v8, %v1481_v21  ;;  %v1573_v21 = vmul.f32 %v3539_v9, %v4505_v46  ;;  %v1575_v9 = vmul.f32 %v4542_v25, %v4517_v12  ;;  %v4600_v12 = vld [vmem:[%s4997_s5 + $0x8] sm:$0xff]  }
 0x586   :  { %1491 = vrot.lane.b32.xlu1 %v1486_v58, %s3725_s27  ;;  %v1578_v58 = vsub.f32 1.0, %v4540_v56 }
 0x587   :  { %1489 = vrot.lane.b32.xlu0 %v1485_v60, %s3725_s27 }
 0x5f8   :  { %v1492_v32 = vpop.permute.xlu1 %1491 }
 0x5f9   :  { %v1490_v36 = vpop.permute.xlu0 %1489 }
 0x5fa   :  { %3374 = vmatprep.mubr.msk.bf16.mxu0 %vm41_vm2, %v1490_v36 }
 0x5fb   :  { %3375 = vmatmul.mubr.msk.bf16.vlgmr.msra.gmra.mrb[40].mxu0 %vm41_vm2, %v1492_v32  ;;  %v1574_v32 = vmul.f32 %v4540_v56, %v4510_v55 }
 0x5fc   :  { %3387 = vmatpush3.bf16.msra.mxu0 %v4398_v59 }
 0x5fd   :  { %3388 = vmatprep.subr.bf16.mxu0 %v4403_v24 }
 0x600   :  { %3389 = vmatpush3.bf16.msra.mxu0 %v4403_v24 }
 0x601   :  { %3402 = vmatprep.subr.bf16.mxu0 %v4398_v59 }
 0x6ce   :  { %v3376_v16 = vpop.f32.mrb[40].mxu0 }
 0x6cf   :  { %v1533_v31 = vpop.f32.mrb[41].mxu0 }
 0x6d0   :  { %1552 = vrot.lane.b32.xlu0 %v1533_v31, %s3726_s28  ;;  %v3377_v5 = vpop.f32.mrb[42].mxu0 }
 0x6d1   :  { %v1536_v15 = vpop.f32.mrb[43].mxu0 }
 0x6d2   :  { %1554 = vrot.lane.b32.xlu1 %v1536_v15, %s3726_s28 }
 0x6d4   :  { %1556 = vrot.lane.b32.xlu0 %v3376_v16, %s3726_s28 }
 0x6d6   :  { %1558 = vrot.lane.b32.xlu1 %v3377_v5, %s3726_s28 }
 0x742   :  { %v1553_v0 = vpop.permute.xlu0 %1552 }
 0x743   :  { %v1564_v2 = vadd.f32 %v1553_v0, %v4355_v11 }
 0x744   :  { %v1555_v57 = vpop.permute.xlu1 %1554 }
 0x745   :  { %3540 = vtanh.f32 %v1564_v2  ;;  %v1565_v23 = vadd.f32 %v1555_v57, %v4361_v38  ;;  %v1576_v38 = vsub.f32 1.0, %v3535_v3 }
 0x746   :  { %v1557_v22 = vpop.permute.xlu0 %1556 }
 0x747   :  { %3542 = vtanh.f32 %v1565_v23  ;;  %v1566_v4 = vadd.f32 %v1557_v22, %v4423_v17  ;;  %v1572_v17 = vmul.f32 %v3535_v3, %v4501_v35  ;;  %v1579_v35 = vsub.f32 1.0, %v4542_v25 }
 0x748   :  { %v1559_v45 = vpop.permute.xlu1 %1558 }
 0x749   :  { %3544 = vtanh.f32 %v1566_v4  ;;  %v1567_v49 = vadd.f32 %v1559_v45, %v4432_v14 }
 0x74b   :  { %3546 = vtanh.f32 %v1567_v49 }
 0x74f   :  { %v3541_v52 = vpop.eup %3540 }
 0x750   :  { %1584 = vrot.lane.b32.xlu0 %v3541_v52, %s3726_s28 }
 0x751   :  { %v3543_v42 = vpop.eup %3542 }
 0x752   :  { %1586 = vrot.lane.b32.xlu1 %v3543_v42, %s3726_s28 }
 0x753   :  { %v3545_v11 = vpop.eup %3544 }
 0x754   :  { %1588 = vrot.lane.b32.xlu0 %v3545_v11, %s3726_s28 }
 0x755   :  { %v3547_v51 = vpop.eup %3546 }
 0x756   :  { %1590 = vrot.lane.b32.xlu1 %v3547_v51, %s3726_s28 }
 0x7c2   :  { %v1585_v34 = vpop.permute.xlu0 %1584 }
 0x7c3   :  { %v1596_v6 = vmul.f32 %v1585_v34, %v1576_v38 }
 0x7c4   :  { %v1587_v14 = vpop.permute.xlu1 %1586 }
 0x7c5   :  { %v4567_v39 = vadd.f32 %v1596_v6, %v1572_v17  ;;  %v1597_v8 = vmul.f32 %v1587_v14, %v1577_v26 }
 0x7c6   :  { %v1589_v60 = vpop.permute.xlu0 %1588 }
 0x7c7   :  { %v4571_v36 = vadd.f32 %v1597_v8, %v1573_v21  ;;  %v1598_v16 = vmul.f32 %v1589_v60, %v1578_v58  ;;  %1693 = vrot.lane.b32.xlu0 %v4567_v39, %s3723_s4 }
 0x7c8   :  { %v1591_v3 = vpop.permute.xlu1 %1590 }
 0x7c9   :  { %v1604_v31 = vpack.c.bf16 %v4571_v36, %v4567_v39  ;;  %v4580_v46 = vadd.f32 %v1598_v16, %v1574_v32  ;;  %v1599_v5 = vmul.f32 %v1591_v3, %v1579_v35  ;;  %1695 = vrot.lane.b32.xlu1 %v4571_v36, %s3723_s4 }
 0x7cb   :  { %v4586_v55 = vadd.f32 %v1599_v5, %v1575_v9  ;;  %1697 = vrot.lane.b32.xlu0 %v4580_v46, %s3723_s4  ;;  %3382 = vmatprep.mubr.msk.bf16.mxu1 %vm41_vm2, %v1604_v31 }
 0x7cd   :  { %v1605_v56 = vpack.c.bf16 %v4586_v55, %v4580_v46  ;;  %1699 = vrot.lane.b32.xlu1 %v4586_v55, %s3723_s4 }
 0x7cf   :  { %3383 = vmatmul.mubr.msk.bf16.vlgmr.msra.gmra.mrb[40].mxu1 %vm41_vm2, %v1605_v56 }
 0x7d0   :  { %3395 = vmatpush3.bf16.msra.mxu1 %v4530_v43 }
 0x7d1   :  { %3396 = vmatprep.subr.bf16.mxu1 %v4600_v12 }
 0x7d4   :  { %3397 = vmatpush3.bf16.msra.mxu1 %v4600_v12 }
 0x7d5   :  { %3410 = vmatprep.subr.bf16.mxu1 %v4530_v43 }
 0x839   :  { %v1694_v21 = vpop.permute.xlu0 %1693 }
 0x83b   :  { %v1696_v8 = vpop.permute.xlu1 %1695 }
 0x83d   :  { %v1698_v16 = vpop.permute.xlu0 %1697 }
 0x83f   :  { %v1700_v35 = vpop.permute.xlu1 %1699 }
 0x8a2   :  { %v3384_v25 = vpop.f32.mrb[40].mxu1 }
 0x8a3   :  { %v1663_v15 = vadd.f32 %v3384_v25, %v4446_v54  ;;  %v1646_v0 = vpop.f32.mrb[41].mxu1 }
 0x8a4   :  { %v1661_v2 = vadd.f32 %v1646_v0, %v4372_v30  ;;  %v3385_v57 = vpop.f32.mrb[42].mxu1 }
 0x8a5   :  { %v3116_v23 = vmul.f32 -1.442695, %v1663_v15  ;;  %v1664_v22 = vadd.f32 %v3385_v57, %v4452_v33  ;;  %v1649_v4 = vpop.f32.mrb[43].mxu1 }
 0x8a6   :  { %v3114_v45 = vmul.f32 -1.442695, %v1661_v2  ;;  %v1662_v49 = vadd.f32 %v1649_v4, %v4378_v40 }
 0x8a7   :  { %3548 = vpow2.f32 %v3116_v23  ;;  %v3117_v52 = vmul.f32 -1.442695, %v1664_v22 }
 0x8a8   :  { %3550 = vpow2.f32 %v3114_v45  ;;  %v3115_v42 = vmul.f32 -1.442695, %v1662_v49 }
 0x8a9   :  { %3552 = vpow2.f32 %v3117_v52 }
 0x8aa   :  { %3554 = vpow2.f32 %v3115_v42 }
 0x8b1   :  { %v3549_v11 = vpop.eup %3548 }
 0x8b2   :  { %v3551_v51 = vpop.eup %3550  ;;  %v1679_v38 = vadd.f32 1.0, %v3549_v11 }
 0x8b3   :  { %v3553_v34 = vpop.eup %3552  ;;  %v1677_v17 = vadd.f32 1.0, %v3551_v51 }
 0x8b4   :  { %v3555_v6 = vpop.eup %3554  ;;  %3556 = vrcp.f32 %v1679_v38  ;;  %v1680_v26 = vadd.f32 1.0, %v3553_v34 }
 0x8b5   :  { %3558 = vrcp.f32 %v1677_v17  ;;  %v1678_v14 = vadd.f32 1.0, %v3555_v6 }
 0x8b6   :  { %3560 = vrcp.f32 %v1680_v26 }
 0x8b7   :  { %3562 = vrcp.f32 %v1678_v14 }
 0x8be   :  { %v4609_v58 = vpop.eup %3556 }
 0x8bf   :  { %v3559_v60 = vpop.eup %3558  ;;  %v1707_v31 = vmul.f32 %v4609_v58, %v1698_v16 }
 0x8c0   :  { %v4611_v32 = vpop.eup %3560  ;;  %v1705_v5 = vmul.f32 %v3559_v60, %v1694_v21 }
 0x8c1   :  { %v3563_v3 = vpop.eup %3562  ;;  %v1708_v9 = vmul.f32 %v4611_v32, %v1700_v35 }
 0x8c2   :  { %v1706_v56 = vmul.f32 %v3563_v3, %v1696_v8  ;;  %v1801_v8 = vsub.f32 1.0, %v3563_v3  ;;  %v1797_v35 = vmul.f32 %v3563_v3, %v4571_v36  ;;  %v1799_v3 = vmul.f32 %v4611_v32, %v4586_v55 }
 0x8c3   :  { %v1710_v25 = vpack.c.bf16 %v1708_v9, %v1707_v31  ;;  %v1802_v9 = vsub.f32 1.0, %v4609_v58 }
 0x8c4   :  { %v1709_v15 = vpack.c.bf16 %v1706_v56, %v1705_v5 }
 0x8c5   :  { %1715 = vrot.lane.b32.xlu1 %v1710_v25, %s3725_s27  ;;  %v1798_v25 = vmul.f32 %v4609_v58, %v4580_v46 }
 0x8c6   :  { %1713 = vrot.lane.b32.xlu0 %v1709_v15, %s3725_s27 }
 0x937   :  { %v1716_v2 = vpop.permute.xlu1 %1715 }
 0x938   :  { %v1714_v0 = vpop.permute.xlu0 %1713 }
 0x939   :  { %3390 = vmatprep.mubr.msk.bf16.mxu0 %vm41_vm2, %v1714_v0 }
 0x93a   :  { %3391 = vmatmul.mubr.msk.bf16.vlgmr.msra.gmra.mrb[44].mxu0 %vm41_vm2, %v1716_v2 }
 0x93b   :  { %3403 = vmatpush3.bf16.msra.mxu0 %v4398_v59 }
 0x93c   :  { %3404 = vmatprep.subr.bf16.mxu0 %v4403_v24 }
 0x93f   :  { %3405 = vmatpush3.bf16.msra.mxu0 %v4403_v24 }
 0x940   :  { %3418 = vmatprep.subr.bf16.mxu0 %v4398_v59 }
 0xa0d   :  { %v3392_v57 = vpop.f32.mrb[44].mxu0 }
 0xa0e   :  { %v1757_v23 = vpop.f32.mrb[45].mxu0 }
 0xa0f   :  { %1776 = vrot.lane.b32.xlu0 %v1757_v23, %s3726_s28  ;;  %v3393_v22 = vpop.f32.mrb[46].mxu0 }
 0xa10   :  { %v1760_v4 = vpop.f32.mrb[47].mxu0 }
 0xa11   :  { %1778 = vrot.lane.b32.xlu1 %v1760_v4, %s3726_s28 }
 0xa13   :  { %1780 = vrot.lane.b32.xlu0 %v3392_v57, %s3726_s28 }
 0xa15   :  { %1782 = vrot.lane.b32.xlu1 %v3393_v22, %s3726_s28 }
 0xa81   :  { %v1777_v45 = vpop.permute.xlu0 %1776 }
 0xa82   :  { %v1788_v49 = vadd.f32 %v1777_v45, %v4372_v30 }
 0xa83   :  { %v1779_v52 = vpop.permute.xlu1 %1778 }
 0xa84   :  { %3564 = vtanh.f32 %v1788_v49  ;;  %v1789_v42 = vadd.f32 %v1779_v52, %v4378_v40  ;;  %v1800_v40 = vsub.f32 1.0, %v3559_v60 }
 0xa85   :  { %v1781_v11 = vpop.permute.xlu0 %1780 }
 0xa86   :  { %3566 = vtanh.f32 %v1789_v42  ;;  %v1790_v51 = vadd.f32 %v1781_v11, %v4446_v54  ;;  %v1796_v54 = vmul.f32 %v3559_v60, %v4567_v39  ;;  %v1803_v39 = vsub.f32 1.0, %v4611_v32 }
 0xa87   :  { %v1783_v38 = vpop.permute.xlu1 %1782 }
 0xa88   :  { %3568 = vtanh.f32 %v1790_v51  ;;  %v1791_v34 = vadd.f32 %v1783_v38, %v4452_v33 }
 0xa8a   :  { %3570 = vtanh.f32 %v1791_v34 }
 0xa8e   :  { %v3565_v17 = vpop.eup %3564 }
 0xa8f   :  { %1808 = vrot.lane.b32.xlu0 %v3565_v17, %s3726_s28 }
 0xa90   :  { %v3567_v6 = vpop.eup %3566 }
 0xa91   :  { %1810 = vrot.lane.b32.xlu1 %v3567_v6, %s3726_s28 }
 0xa92   :  { %v3569_v30 = vpop.eup %3568 }
 0xa93   :  { %1812 = vrot.lane.b32.xlu0 %v3569_v30, %s3726_s28 }
 0xa94   :  { %v3571_v26 = vpop.eup %3570 }
 0xa95   :  { %1814 = vrot.lane.b32.xlu1 %v3571_v26, %s3726_s28 }
 0xb01   :  { %v1809_v14 = vpop.permute.xlu0 %1808 }
 0xb02   :  { %v1820_v21 = vmul.f32 %v1809_v14, %v1800_v40 }
 0xb03   :  { %v1811_v33 = vpop.permute.xlu1 %1810 }
 0xb04   :  { %v4636_v16 = vadd.f32 %v1820_v21, %v1796_v54  ;;  %v1821_v31 = vmul.f32 %v1811_v33, %v1801_v8 }
 0xb05   :  { %v1813_v5 = vpop.permute.xlu0 %1812 }
 0xb06   :  { %v4640_v56 = vadd.f32 %v1821_v31, %v1797_v35  ;;  %v1822_v15 = vmul.f32 %v1813_v5, %v1802_v9  ;;  %1917 = vrot.lane.b32.xlu0 %v4636_v16, %s3723_s4 }
 0xb07   :  { %v1815_v60 = vpop.permute.xlu1 %1814 }
 0xb08   :  { %v1828_v0 = vpack.c.bf16 %v4640_v56, %v4636_v16  ;;  %v4649_v36 = vadd.f32 %v1822_v15, %v1798_v25  ;;  %v1823_v2 = vmul.f32 %v1815_v60, %v1803_v39  ;;  %1919 = vrot.lane.b32.xlu1 %v4640_v56, %s3723_s4 }
 0xb0a   :  { %v4655_v46 = vadd.f32 %v1823_v2, %v1799_v3  ;;  %1921 = vrot.lane.b32.xlu0 %v4649_v36, %s3723_s4  ;;  %3398 = vmatprep.mubr.msk.bf16.mxu1 %vm41_vm2, %v1828_v0 }
 0xb0c   :  { %v1829_v58 = vpack.c.bf16 %v4655_v46, %v4649_v36  ;;  %1923 = vrot.lane.b32.xlu1 %v4655_v46, %s3723_s4 }
 0xb0e   :  { %3399 = vmatmul.mubr.msk.bf16.vlgmr.msra.gmra.mrb[44].mxu1 %vm41_vm2, %v1829_v58 }
 0xb0f   :  { %3411 = vmatpush3.bf16.msra.mxu1 %v4530_v43 }
 0xb10   :  { %3412 = vmatprep.subr.bf16.mxu1 %v4600_v12 }
 0xb13   :  { %3413 = vmatpush3.bf16.msra.mxu1 %v4600_v12 }
 0xb14   :  { %3426 = vmatprep.subr.bf16.mxu1 %v4530_v43 }
 0xb78   :  { %v1918_v54 = vpop.permute.xlu0 %1917 }
 0xb7a   :  { %v1920_v21 = vpop.permute.xlu1 %1919 }
 0xb7c   :  { %v1922_v31 = vpop.permute.xlu0 %1921 }
 0xb7e   :  { %v1924_v9 = vpop.permute.xlu1 %1923 }
 0xbe1   :  { %v3400_v55 = vpop.f32.mrb[44].mxu1 }
 0xbe2   :  { %v1887_v32 = vadd.f32 %v3400_v55, %v4443_v41  ;;  %v1870_v57 = vpop.f32.mrb[45].mxu1 }
 0xbe3   :  { %v1885_v23 = vadd.f32 %v1870_v57, %v4369_v7  ;;  %v3401_v22 = vpop.f32.mrb[46].mxu1 }
 0xbe4   :  { %v3124_v4 = vmul.f32 -1.442695, %v1887_v32  ;;  %v1888_v45 = vadd.f32 %v3401_v22, %v4449_v37  ;;  %v1873_v49 = vpop.f32.mrb[47].mxu1 }
 0xbe5   :  { %v3122_v52 = vmul.f32 -1.442695, %v1885_v23  ;;  %v1886_v42 = vadd.f32 %v1873_v49, %v4375_v44 }
 0xbe6   :  { %3572 = vpow2.f32 %v3124_v4  ;;  %v3125_v11 = vmul.f32 -1.442695, %v1888_v45 }
 0xbe7   :  { %3574 = vpow2.f32 %v3122_v52  ;;  %v3123_v51 = vmul.f32 -1.442695, %v1886_v42 }
 0xbe8   :  { %3576 = vpow2.f32 %v3125_v11 }
 0xbe9   :  { %3578 = vpow2.f32 %v3123_v51 }
 0xbf0   :  { %v3573_v38 = vpop.eup %3572 }
 0xbf1   :  { %v3575_v34 = vpop.eup %3574  ;;  %v1903_v17 = vadd.f32 1.0, %v3573_v38 }
 0xbf2   :  { %v3577_v6 = vpop.eup %3576  ;;  %v1901_v30 = vadd.f32 1.0, %v3575_v34 }
 0xbf3   :  { %v3579_v26 = vpop.eup %3578  ;;  %3580 = vrcp.f32 %v1903_v17  ;;  %v1904_v40 = vadd.f32 1.0, %v3577_v6 }
 0xbf4   :  { %3582 = vrcp.f32 %v1901_v30  ;;  %v1902_v14 = vadd.f32 1.0, %v3579_v26 }
 0xbf5   :  { %3584 = vrcp.f32 %v1904_v40 }
 0xbf6   :  { %3586 = vrcp.f32 %v1902_v14 }
 0xbfd   :  { %v4673_v8 = vpop.eup %3580 }
 0xbfe   :  { %v3583_v33 = vpop.eup %3582  ;;  %v1931_v25 = vmul.f32 %v4673_v8, %v1922_v31  ;;  %v2026_v14 = vsub.f32 1.0, %v4673_v8  ;;  %v2022_v31 = vmul.f32 %v4673_v8, %v4649_v36 }
 0xbff   :  { %v4675_v35 = vpop.eup %3584  ;;  %v1929_v39 = vmul.f32 %v3583_v33, %v1918_v54 }
 0xc00   :  { %v3587_v5 = vpop.eup %3586  ;;  %v1932_v15 = vmul.f32 %v4675_v35, %v1924_v9 }
 0xc01   :  { %v1930_v60 = vmul.f32 %v3587_v5, %v1920_v21  ;;  %v2025_v6 = vsub.f32 1.0, %v3587_v5  ;;  %v2021_v26 = vmul.f32 %v3587_v5, %v4640_v56  ;;  %v2023_v5 = vmul.f32 %v4675_v35, %v4655_v46 }
 0xc02   :  { %v1934_v0 = vpack.c.bf16 %v1932_v15, %v1931_v25 }
 0xc03   :  { %v1933_v3 = vpack.c.bf16 %v1930_v60, %v1929_v39 }
 0xc04   :  { %1939 = vrot.lane.b32.xlu1 %v1934_v0, %s3725_s27 }
 0xc05   :  { %1937 = vrot.lane.b32.xlu0 %v1933_v3, %s3725_s27 }
 0xc76   :  { %v1940_v58 = vpop.permute.xlu1 %1939 }
 0xc77   :  { %v1938_v2 = vpop.permute.xlu0 %1937 }
 0xc78   :  { %3406 = vmatprep.mubr.msk.bf16.mxu0 %vm41_vm2, %v1938_v2 }
 0xc79   :  { %3407 = vmatmul.mubr.msk.bf16.vlgmr.msra.gmra.mrb[48].mxu0 %vm41_vm2, %v1940_v58 }
 0xc7a   :  { %3419 = vmatpush3.bf16.msra.mxu0 %v4398_v59 }
 0xc7b   :  { %3420 = vmatprep.subr.bf16.mxu0 %v4403_v24 }
 0xc7e   :  { %3421 = vmatpush3.bf16.msra.mxu0 %v4403_v24 }
 0xc7f   :  { %3434 = vmatprep.subr.bf16.mxu0 %v4398_v59 }
 0xd4c   :  { %v3408_v55 = vpop.f32.mrb[48].mxu0 }
 0xd4d   :  { %v1981_v32 = vpop.f32.mrb[49].mxu0 }
 0xd4e   :  { %2000 = vrot.lane.b32.xlu0 %v1981_v32, %s3726_s28  ;;  %v3409_v57 = vpop.f32.mrb[50].mxu0 }
 0xd4f   :  { %v1984_v23 = vpop.f32.mrb[51].mxu0 }
 0xd50   :  { %2002 = vrot.lane.b32.xlu1 %v1984_v23, %s3726_s28 }
 0xd52   :  { %2004 = vrot.lane.b32.xlu0 %v3408_v55, %s3726_s28 }
 0xd54   :  { %2006 = vrot.lane.b32.xlu1 %v3409_v57, %s3726_s28 }
 0xdc0   :  { %v2001_v22 = vpop.permute.xlu0 %2000 }
 0xdc1   :  { %v2012_v4 = vadd.f32 %v2001_v22, %v4369_v7 }
 0xdc2   :  { %v2003_v45 = vpop.permute.xlu1 %2002 }
 0xdc3   :  { %3588 = vtanh.f32 %v2012_v4  ;;  %v2013_v24 = vadd.f32 %v2003_v45, %v4375_v44  ;;  %v2024_v44 = vsub.f32 1.0, %v3583_v33 }
 0xdc4   :  { %v2005_v59 = vpop.permute.xlu0 %2004 }
 0xdc5   :  { %3590 = vtanh.f32 %v2013_v24  ;;  %v2014_v49 = vadd.f32 %v2005_v59, %v4443_v41  ;;  %v2020_v41 = vmul.f32 %v3583_v33, %v4636_v16  ;;  %v2027_v16 = vsub.f32 1.0, %v4675_v35 }
 0xdc6   :  { %v2007_v52 = vpop.permute.xlu1 %2006 }
 0xdc7   :  { %3592 = vtanh.f32 %v2014_v49  ;;  %v2015_v42 = vadd.f32 %v2007_v52, %v4449_v37 }
 0xdc9   :  { %3594 = vtanh.f32 %v2015_v42 }
 0xdcd   :  { %v3589_v11 = vpop.eup %3588 }
 0xdce   :  { %2032 = vrot.lane.b32.xlu0 %v3589_v11, %s3726_s28 }
 0xdcf   :  { %v3591_v51 = vpop.eup %3590 }
 0xdd0   :  { %2034 = vrot.lane.b32.xlu1 %v3591_v51, %s3726_s28 }
 0xdd1   :  { %v3593_v7 = vpop.eup %3592 }
 0xdd2   :  { %2036 = vrot.lane.b32.xlu0 %v3593_v7, %s3726_s28 }
 0xdd3   :  { %v3595_v38 = vpop.eup %3594 }
 0xdd4   :  { %2038 = vrot.lane.b32.xlu1 %v3595_v38, %s3726_s28 }
 0xe40   :  { %v2033_v34 = vpop.permute.xlu0 %2032 }
 0xe41   :  { %v2044_v17 = vmul.f32 %v2033_v34, %v2024_v44 }
 0xe42   :  { %v2035_v37 = vpop.permute.xlu1 %2034 }
 0xe43   :  { %v4700_v30 = vadd.f32 %v2044_v17, %v2020_v41  ;;  %v2045_v40 = vmul.f32 %v2035_v37, %v2025_v6 }
 0xe44   :  { %v2037_v54 = vpop.permute.xlu0 %2036 }
 0xe45   :  { %v4704_v21 = vadd.f32 %v2045_v40, %v2021_v26  ;;  %v2046_v9 = vmul.f32 %v2037_v54, %v2026_v14  ;;  %2141 = vrot.lane.b32.xlu0 %v4700_v30, %s3723_s4 }
 0xe46   :  { %v2039_v33 = vpop.permute.xlu1 %2038 }
 0xe47   :  { %v2052_v25 = vpack.c.bf16 %v4704_v21, %v4700_v30  ;;  %v4713_v56 = vadd.f32 %v2046_v9, %v2022_v31  ;;  %v2047_v15 = vmul.f32 %v2039_v33, %v2027_v16  ;;  %2143 = vrot.lane.b32.xlu1 %v4704_v21, %s3723_s4  ;;  %v4750_v16 = vld [vmem:[%s4998_s6] sm:$0xff]   ;;  %v4756_v33 = vld [vmem:[%s4998_s6 + $0x8] sm:$0xff]  }
 0xe49   :  { %v4719_v36 = vadd.f32 %v2047_v15, %v2023_v5  ;;  %2145 = vrot.lane.b32.xlu0 %v4713_v56, %s3723_s4  ;;  %3414 = vmatprep.mubr.msk.bf16.mxu1 %vm41_vm2, %v2052_v25 }
 0xe4b   :  { %v2053_v8 = vpack.c.bf16 %v4719_v36, %v4713_v56  ;;  %2147 = vrot.lane.b32.xlu1 %v4719_v36, %s3723_s4 }
 0xe4d   :  { %3415 = vmatmul.mubr.msk.bf16.vlgmr.msra.gmra.mrb[48].mxu1 %vm41_vm2, %v2053_v8 }
 0xe4e   :  { %3427 = vmatpush3.bf16.msra.mxu1 %v4530_v43 }
 0xe4f   :  { %3428 = vmatprep.subr.bf16.mxu1 %v4600_v12 }
 0xe52   :  { %3429 = vmatpush3.bf16.msra.mxu1 %v4600_v12 }
 0xe53   :  { %3442 = vmatprep.subr.bf16.mxu1 %v4530_v43 }
 0xeb7   :  { %v2142_v11 = vpop.permute.xlu0 %2141 }
 0xeb9   :  { %v2144_v51 = vpop.permute.xlu1 %2143 }
 0xebb   :  { %v2146_v34 = vpop.permute.xlu0 %2145 }
 0xebd   :  { %v2148_v41 = vpop.permute.xlu1 %2147 }
 0xf20   :  { %v3416_v46 = vpop.f32.mrb[48].mxu1 }
 0xf21   :  { %v2111_v35 = vadd.f32 %v3416_v46, %v4458_v50  ;;  %v2094_v39 = vpop.f32.mrb[49].mxu1 }
 0xf22   :  { %v2109_v60 = vadd.f32 %v2094_v39, %v4384_v27  ;;  %v3417_v0 = vpop.f32.mrb[50].mxu1 }
 0xf23   :  { %v3132_v3 = vmul.f32 -1.442695, %v2111_v35  ;;  %v2112_v2 = vadd.f32 %v3417_v0, %v4464_v19  ;;  %v2097_v58 = vpop.f32.mrb[51].mxu1 }
 0xf24   :  { %v3130_v55 = vmul.f32 -1.442695, %v2109_v60  ;;  %v2110_v32 = vadd.f32 %v2097_v58, %v4390_v18 }
 0xf25   :  { %3596 = vpow2.f32 %v3132_v3  ;;  %v3133_v57 = vmul.f32 -1.442695, %v2112_v2 }
 0xf26   :  { %3598 = vpow2.f32 %v3130_v55  ;;  %v3131_v23 = vmul.f32 -1.442695, %v2110_v32 }
 0xf27   :  { %3600 = vpow2.f32 %v3133_v57 }
 0xf28   :  { %3602 = vpow2.f32 %v3131_v23 }
 0xf2f   :  { %v3597_v22 = vpop.eup %3596 }
 0xf30   :  { %v3599_v4 = vpop.eup %3598  ;;  %v2127_v45 = vadd.f32 1.0, %v3597_v22 }
 0xf31   :  { %v3601_v24 = vpop.eup %3600  ;;  %v2125_v59 = vadd.f32 1.0, %v3599_v4 }
 0xf32   :  { %v3603_v49 = vpop.eup %3602  ;;  %3604 = vrcp.f32 %v2127_v45  ;;  %v2128_v52 = vadd.f32 1.0, %v3601_v24 }
 0xf33   :  { %3606 = vrcp.f32 %v2125_v59  ;;  %v2126_v42 = vadd.f32 1.0, %v3603_v49 }
 0xf34   :  { %3608 = vrcp.f32 %v2128_v52 }
 0xf35   :  { %3610 = vrcp.f32 %v2126_v42 }
 0xf3c   :  { %v4737_v7 = vpop.eup %3604 }
 0xf3d   :  { %v3607_v38 = vpop.eup %3606  ;;  %v2155_v6 = vmul.f32 %v4737_v7, %v2146_v34  ;;  %v2250_v49 = vsub.f32 1.0, %v4737_v7 }
 0xf3e   :  { %v4739_v44 = vpop.eup %3608  ;;  %v2153_v26 = vmul.f32 %v3607_v38, %v2142_v11  ;;  %v2246_v11 = vmul.f32 %v4737_v7, %v4713_v56 }
 0xf3f   :  { %v3611_v17 = vpop.eup %3610  ;;  %v2156_v37 = vmul.f32 %v4739_v44, %v2148_v41  ;;  %v2247_v41 = vmul.f32 %v4739_v44, %v4719_v36 }
 0xf40   :  { %v2154_v40 = vmul.f32 %v3611_v17, %v2144_v51  ;;  %v2249_v4 = vsub.f32 1.0, %v3611_v17  ;;  %v2245_v24 = vmul.f32 %v3611_v17, %v4704_v21 }
 0xf41   :  { %v2158_v14 = vpack.c.bf16 %v2156_v37, %v2155_v6 }
 0xf42   :  { %v2157_v54 = vpack.c.bf16 %v2154_v40, %v2153_v26 }
 0xf43   :  { %2163 = vrot.lane.b32.xlu1 %v2158_v14, %s3725_s27 }
 0xf44   :  { %2161 = vrot.lane.b32.xlu0 %v2157_v54, %s3725_s27 }
 0xfb5   :  { %v2164_v9 = vpop.permute.xlu1 %2163 }
 0xfb6   :  { %v2162_v31 = vpop.permute.xlu0 %2161 }
 0xfb7   :  { %3422 = vmatprep.mubr.msk.bf16.mxu0 %vm41_vm2, %v2162_v31 }
 0xfb8   :  { %3423 = vmatmul.mubr.msk.bf16.vlgmr.msra.gmra.mrb[52].mxu0 %vm41_vm2, %v2164_v9 }
 0xfb9   :  { %3435 = vmatpush3.bf16.msra.mxu0 %v4750_v16 }
 0xfba   :  { %3436 = vmatprep.subr.bf16.mxu0 %v4756_v33 }
 0xfbd   :  { %3437 = vmatpush3.bf16.msra.mxu0 %v4756_v33 }
 0xfbe   :  { %3450 = vmatprep.subr.bf16.mxu0 %v4750_v16 }
0x108b   :  { %v3424_v25 = vpop.f32.mrb[52].mxu0 }
0x108c   :  { %v2205_v5 = vpop.f32.mrb[53].mxu0 }
0x108d   :  { %2224 = vrot.lane.b32.xlu0 %v2205_v5, %s3726_s28  ;;  %v3425_v15 = vpop.f32.mrb[54].mxu0 }
0x108e   :  { %v2208_v8 = vpop.f32.mrb[55].mxu0 }
0x108f   :  { %2226 = vrot.lane.b32.xlu1 %v2208_v8, %s3726_s28 }
0x1091   :  { %2228 = vrot.lane.b32.xlu0 %v3424_v25, %s3726_s28 }
0x1093   :  { %2230 = vrot.lane.b32.xlu1 %v3425_v15, %s3726_s28 }
0x10ff   :  { %v2225_v46 = vpop.permute.xlu0 %2224 }
0x1100   :  { %v2236_v35 = vadd.f32 %v2225_v46, %v4384_v27 }
0x1101   :  { %v2227_v39 = vpop.permute.xlu1 %2226 }
0x1102   :  { %3612 = vtanh.f32 %v2236_v35  ;;  %v2237_v60 = vadd.f32 %v2227_v39, %v4390_v18  ;;  %v2248_v18 = vsub.f32 1.0, %v3607_v38 }
0x1103   :  { %v2229_v0 = vpop.permute.xlu0 %2228 }
0x1104   :  { %3614 = vtanh.f32 %v2237_v60  ;;  %v2238_v3 = vadd.f32 %v2229_v0, %v4458_v50  ;;  %v2244_v50 = vmul.f32 %v3607_v38, %v4700_v30  ;;  %v2251_v30 = vsub.f32 1.0, %v4739_v44 }
0x1105   :  { %v2231_v2 = vpop.permute.xlu1 %2230 }
0x1106   :  { %3616 = vtanh.f32 %v2238_v3  ;;  %v2239_v58 = vadd.f32 %v2231_v2, %v4464_v19 }
0x1108   :  { %3618 = vtanh.f32 %v2239_v58 }
0x110c   :  { %v3613_v55 = vpop.eup %3612 }
0x110d   :  { %2256 = vrot.lane.b32.xlu0 %v3613_v55, %s3726_s28 }
0x110e   :  { %v3615_v32 = vpop.eup %3614 }
0x110f   :  { %2258 = vrot.lane.b32.xlu1 %v3615_v32, %s3726_s28 }
0x1110   :  { %v3617_v27 = vpop.eup %3616 }
0x1111   :  { %2260 = vrot.lane.b32.xlu0 %v3617_v27, %s3726_s28 }
0x1112   :  { %v3619_v57 = vpop.eup %3618 }
0x1113   :  { %2262 = vrot.lane.b32.xlu1 %v3619_v57, %s3726_s28 }
0x117f   :  { %v2257_v23 = vpop.permute.xlu0 %2256 }
0x1180   :  { %v2268_v22 = vmul.f32 %v2257_v23, %v2248_v18 }
0x1181   :  { %v2259_v19 = vpop.permute.xlu1 %2258 }
0x1182   :  { %v4774_v45 = vadd.f32 %v2268_v22, %v2244_v50  ;;  %v2269_v59 = vmul.f32 %v2259_v19, %v2249_v4 }
0x1183   :  { %v2261_v52 = vpop.permute.xlu0 %2260 }
0x1184   :  { %v4778_v42 = vadd.f32 %v2269_v59, %v2245_v24  ;;  %v2270_v51 = vmul.f32 %v2261_v52, %v2250_v49  ;;  %2365 = vrot.lane.b32.xlu0 %v4774_v45, %s3723_s4 }
0x1185   :  { %v2263_v38 = vpop.permute.xlu1 %2262 }
0x1186   :  { %v2276_v34 = vpack.c.bf16 %v4778_v42, %v4774_v45  ;;  %v4787_v21 = vadd.f32 %v2270_v51, %v2246_v11  ;;  %v2271_v17 = vmul.f32 %v2263_v38, %v2251_v30  ;;  %2367 = vrot.lane.b32.xlu1 %v4778_v42, %s3723_s4 }
0x1188   :  { %v4793_v56 = vadd.f32 %v2271_v17, %v2247_v41  ;;  %2369 = vrot.lane.b32.xlu0 %v4787_v21, %s3723_s4  ;;  %3430 = vmatprep.mubr.msk.bf16.mxu1 %vm41_vm2, %v2276_v34 }
0x118a   :  { %v2277_v7 = vpack.c.bf16 %v4793_v56, %v4787_v21  ;;  %2371 = vrot.lane.b32.xlu1 %v4793_v56, %s3723_s4 }
0x118c   :  { %3431 = vmatmul.mubr.msk.bf16.vlgmr.msra.gmra.mrb[52].mxu1 %vm41_vm2, %v2277_v7 }
0x118d   :  { %3443 = vmatpush3.bf16.msra.mxu1 %v4530_v43 }
0x118e   :  { %3444 = vmatprep.subr.bf16.mxu1 %v4600_v12 }
0x1191   :  { %3445 = vmatpush3.bf16.msra.mxu1 %v4600_v12 }
0x1192   :  { %3458 = vmatprep.subr.bf16.mxu1 %v4530_v43 }
0x11f6   :  { %v2366_v3 = vpop.permute.xlu0 %2365 }
0x11f8   :  { %v2368_v2 = vpop.permute.xlu1 %2367 }
0x11fa   :  { %v2370_v27 = vpop.permute.xlu0 %2369 }
0x11fc   :  { %v2372_v57 = vpop.permute.xlu1 %2371 }
0x125f   :  { %v3432_v36 = vpop.f32.mrb[52].mxu1 }
0x1260   :  { %v2335_v44 = vadd.f32 %v3432_v36, %v4455_v48  ;;  %v2318_v6 = vpop.f32.mrb[53].mxu1 }
0x1261   :  { %v2333_v37 = vadd.f32 %v2318_v6, %v4381_v62  ;;  %v3433_v26 = vpop.f32.mrb[54].mxu1 }
0x1262   :  { %v3140_v40 = vmul.f32 -1.442695, %v2335_v44  ;;  %v2336_v14 = vadd.f32 %v3433_v26, %v4461_v47  ;;  %v2321_v54 = vpop.f32.mrb[55].mxu1 }
0x1263   :  { %v3138_v31 = vmul.f32 -1.442695, %v2333_v37  ;;  %v2334_v9 = vadd.f32 %v2321_v54, %v4387_v28 }
0x1264   :  { %3620 = vpow2.f32 %v3140_v40  ;;  %v3141_v25 = vmul.f32 -1.442695, %v2336_v14 }
0x1265   :  { %3622 = vpow2.f32 %v3138_v31  ;;  %v3139_v5 = vmul.f32 -1.442695, %v2334_v9 }
0x1266   :  { %3624 = vpow2.f32 %v3141_v25 }
0x1267   :  { %3626 = vpow2.f32 %v3139_v5 }
0x126e   :  { %v3621_v43 = vpop.eup %3620 }
0x126f   :  { %v3623_v15 = vpop.eup %3622  ;;  %v2351_v8 = vadd.f32 1.0, %v3621_v43 }
0x1270   :  { %v3625_v46 = vpop.eup %3624  ;;  %v2349_v35 = vadd.f32 1.0, %v3623_v15 }
0x1271   :  { %v3627_v39 = vpop.eup %3626  ;;  %3628 = vrcp.f32 %v2351_v8  ;;  %v2352_v60 = vadd.f32 1.0, %v3625_v46 }
0x1272   :  { %3630 = vrcp.f32 %v2349_v35  ;;  %v2350_v0 = vadd.f32 1.0, %v3627_v39 }
0x1273   :  { %3632 = vrcp.f32 %v2352_v60 }
0x1274   :  { %3634 = vrcp.f32 %v2350_v0 }
0x127b   :  { %v4811_v58 = vpop.eup %3628 }
0x127c   :  { %v3631_v55 = vpop.eup %3630  ;;  %v2379_v23 = vmul.f32 %v4811_v58, %v2370_v27  ;;  %v2474_v43 = vsub.f32 1.0, %v4811_v58  ;;  %v2470_v46 = vmul.f32 %v4811_v58, %v4787_v21 }
0x127d   :  { %v4813_v32 = vpop.eup %3632  ;;  %v2377_v22 = vmul.f32 %v3631_v55, %v2366_v3 }
0x127e   :  { %v3635_v18 = vpop.eup %3634  ;;  %v2380_v50 = vmul.f32 %v4813_v32, %v2372_v57  ;;  %v2471_v0 = vmul.f32 %v4813_v32, %v4793_v56  ;;  %v3696_v56 = vld [vmem:[%s4997_s5] sm:$0xff]  }
0x127f   :  { %v2378_v4 = vmul.f32 %v3635_v18, %v2368_v2  ;;  %v2473_v31 = vsub.f32 1.0, %v3635_v18  ;;  %v2469_v25 = vmul.f32 %v3635_v18, %v4778_v42 }
0x1280   :  { %v2382_v19 = vpack.c.bf16 %v2380_v50, %v2379_v23 }
0x1281   :  { %v2381_v24 = vpack.c.bf16 %v2378_v4, %v2377_v22 }
0x1282   :  { %2387 = vrot.lane.b32.xlu1 %v2382_v19, %s3725_s27 }
0x1283   :  { %2385 = vrot.lane.b32.xlu0 %v2381_v24, %s3725_s27 }
0x12f4   :  { %v2388_v49 = vpop.permute.xlu1 %2387 }
0x12f5   :  { %v2386_v59 = vpop.permute.xlu0 %2385 }
0x12f6   :  { %3438 = vmatprep.mubr.msk.bf16.mxu0 %vm41_vm2, %v2386_v59 }
0x12f7   :  { %3439 = vmatmul.mubr.msk.bf16.vlgmr.msra.gmra.mrb[56].mxu0 %vm41_vm2, %v2388_v49 }
0x12f8   :  { %3451 = vmatpush3.bf16.msra.mxu0 %v4750_v16 }
0x12f9   :  { %3452 = vmatprep.subr.bf16.mxu0 %v4756_v33 }
0x12fc   :  { %3453 = vmatpush3.bf16.msra.mxu0 %v4756_v33 }
0x12fd   :  { %3466 = vmatprep.subr.bf16.mxu0 %v4750_v16 }
0x13ca   :  { %v3440_v52 = vpop.f32.mrb[56].mxu0 }
0x13cb   :  { %v2429_v11 = vpop.f32.mrb[57].mxu0 }
0x13cc   :  { %2448 = vrot.lane.b32.xlu0 %v2429_v11, %s3726_s28  ;;  %v3441_v51 = vpop.f32.mrb[58].mxu0 }
0x13cd   :  { %v2432_v30 = vpop.f32.mrb[59].mxu0 }
0x13ce   :  { %2450 = vrot.lane.b32.xlu1 %v2432_v30, %s3726_s28 }
0x13d0   :  { %2452 = vrot.lane.b32.xlu0 %v3440_v52, %s3726_s28 }
0x13d2   :  { %2454 = vrot.lane.b32.xlu1 %v3441_v51, %s3726_s28 }
0x143e   :  { %v2449_v38 = vpop.permute.xlu0 %2448 }
0x143f   :  { %v2460_v34 = vadd.f32 %v2449_v38, %v4381_v62 }
0x1440   :  { %v2451_v41 = vpop.permute.xlu1 %2450 }
0x1441   :  { %3636 = vtanh.f32 %v2460_v34  ;;  %v2461_v17 = vadd.f32 %v2451_v41, %v4387_v28  ;;  %v2472_v28 = vsub.f32 1.0, %v3631_v55 }
0x1442   :  { %v2453_v7 = vpop.permute.xlu0 %2452 }
0x1443   :  { %3638 = vtanh.f32 %v2461_v17  ;;  %v2462_v36 = vadd.f32 %v2453_v7, %v4455_v48  ;;  %v2468_v48 = vmul.f32 %v3631_v55, %v4774_v45  ;;  %v2475_v45 = vsub.f32 1.0, %v4813_v32 }
0x1444   :  { %v2455_v44 = vpop.permute.xlu1 %2454 }
0x1445   :  { %3640 = vtanh.f32 %v2462_v36  ;;  %v2463_v6 = vadd.f32 %v2455_v44, %v4461_v47 }
0x1447   :  { %3642 = vtanh.f32 %v2463_v6 }
0x144b   :  { %v3637_v37 = vpop.eup %3636 }
0x144c   :  { %2480 = vrot.lane.b32.xlu0 %v3637_v37, %s3726_s28 }
0x144d   :  { %v3639_v26 = vpop.eup %3638 }
0x144e   :  { %2482 = vrot.lane.b32.xlu1 %v3639_v26, %s3726_s28 }
0x144f   :  { %v3641_v62 = vpop.eup %3640 }
0x1450   :  { %2484 = vrot.lane.b32.xlu0 %v3641_v62, %s3726_s28 }
0x1451   :  { %v3643_v40 = vpop.eup %3642 }
0x1452   :  { %2486 = vrot.lane.b32.xlu1 %v3643_v40, %s3726_s28 }
0x14be   :  { %v2481_v14 = vpop.permute.xlu0 %2480 }
0x14bf   :  { %v2492_v54 = vmul.f32 %v2481_v14, %v2472_v28 }
0x14c0   :  { %v2483_v47 = vpop.permute.xlu1 %2482 }
0x14c1   :  { %v4838_v9 = vadd.f32 %v2492_v54, %v2468_v48  ;;  %v2493_v5 = vmul.f32 %v2483_v47, %v2473_v31 }
0x14c2   :  { %v2485_v15 = vpop.permute.xlu0 %2484 }
0x14c3   :  { %v4842_v8 = vadd.f32 %v2493_v5, %v2469_v25  ;;  %v2494_v35 = vmul.f32 %v2485_v15, %v2474_v43  ;;  %2589 = vrot.lane.b32.xlu0 %v4838_v9, %s3723_s4 }
0x14c4   :  { %v2487_v39 = vpop.permute.xlu1 %2486 }
0x14c5   :  { %v2500_v60 = vpack.c.bf16 %v4842_v8, %v4838_v9  ;;  %v4851_v42 = vadd.f32 %v2494_v35, %v2470_v46  ;;  %v2495_v3 = vmul.f32 %v2487_v39, %v2475_v45  ;;  %2591 = vrot.lane.b32.xlu1 %v4842_v8, %s3723_s4 }
0x14c7   :  { %v4857_v21 = vadd.f32 %v2495_v3, %v2471_v0  ;;  %2593 = vrot.lane.b32.xlu0 %v4851_v42, %s3723_s4  ;;  %3446 = vmatprep.mubr.msk.bf16.mxu1 %vm41_vm2, %v2500_v60 }
0x14c9   :  { %v2501_v2 = vpack.c.bf16 %v4857_v21, %v4851_v42  ;;  %2595 = vrot.lane.b32.xlu1 %v4857_v21, %s3723_s4 }
0x14cb   :  { %3447 = vmatmul.mubr.msk.bf16.vlgmr.msra.gmra.mrb[56].mxu1 %vm41_vm2, %v2501_v2 }
0x14cc   :  { %3459 = vmatpush3.bf16.msra.mxu1 %v3696_v56 }
0x14cd   :  { %3460 = vmatprep.subr.bf16.mxu1 %v4600_v12 }
0x14d0   :  { %3461 = vmatpush3.bf16.msra.mxu1 %v4600_v12 }
0x1535   :  { %v2590_v34 = vpop.permute.xlu0 %2589 }
0x1537   :  { %v2592_v41 = vpop.permute.xlu1 %2591 }
0x1539   :  { %v2594_v44 = vpop.permute.xlu0 %2593 }
0x153b   :  { %v2596_v6 = vpop.permute.xlu1 %2595 }
0x159e   :  { %v3448_v58 = vpop.f32.mrb[56].mxu1 }
0x159f   :  { %v2559_v55 = vadd.f32 %v3448_v58, %v4470_v20  ;;  %v2542_v32 = vpop.f32.mrb[57].mxu1 }
0x15a0   :  { %v2557_v27 = vadd.f32 %v2542_v32, %v4406_v53  ;;  %v3449_v57 = vpop.f32.mrb[58].mxu1 }
0x15a1   :  { %v3148_v18 = vmul.f32 -1.442695, %v2559_v55  ;;  %v2560_v23 = vadd.f32 %v3449_v57, %v4476_v13  ;;  %v2545_v50 = vpop.f32.mrb[59].mxu1 }
0x15a2   :  { %v3146_v22 = vmul.f32 -1.442695, %v2557_v27  ;;  %v2558_v4 = vadd.f32 %v2545_v50, %v4413_v29 }
0x15a3   :  { %3644 = vpow2.f32 %v3148_v18  ;;  %v3149_v19 = vmul.f32 -1.442695, %v2560_v23 }
0x15a4   :  { %3646 = vpow2.f32 %v3146_v22  ;;  %v3147_v24 = vmul.f32 -1.442695, %v2558_v4 }
0x15a5   :  { %3648 = vpow2.f32 %v3149_v19 }
0x15a6   :  { %3650 = vpow2.f32 %v3147_v24 }
0x15ad   :  { %v3645_v12 = vpop.eup %3644 }
0x15ae   :  { %v3647_v59 = vpop.eup %3646  ;;  %v2575_v49 = vadd.f32 1.0, %v3645_v12 }
0x15af   :  { %v3649_v52 = vpop.eup %3648  ;;  %v2573_v11 = vadd.f32 1.0, %v3647_v59 }
0x15b0   :  { %v3651_v51 = vpop.eup %3650  ;;  %3652 = vrcp.f32 %v2575_v49  ;;  %v2576_v30 = vadd.f32 1.0, %v3649_v52 }
0x15b1   :  { %3654 = vrcp.f32 %v2573_v11  ;;  %v2574_v38 = vadd.f32 1.0, %v3651_v51 }
0x15b2   :  { %3656 = vrcp.f32 %v2576_v30 }
0x15b3   :  { %3658 = vrcp.f32 %v2574_v38 }
0x15ba   :  { %v4876_v17 = vpop.eup %3652 }
0x15bb   :  { %v3655_v7 = vpop.eup %3654  ;;  %v2603_v26 = vmul.f32 %v4876_v17, %v2594_v44  ;;  %v2698_v18 = vsub.f32 1.0, %v4876_v17  ;;  %v2694_v22 = vmul.f32 %v4876_v17, %v4851_v42 }
0x15bc   :  { %v4878_v36 = vpop.eup %3656  ;;  %v2601_v40 = vmul.f32 %v3655_v7, %v2590_v34 }
0x15bd   :  { %v3659_v37 = vpop.eup %3658  ;;  %v2604_v62 = vmul.f32 %v4878_v36, %v2596_v6  ;;  %v2695_v12 = vmul.f32 %v4878_v36, %v4857_v21 }
0x15be   :  { %v2602_v28 = vmul.f32 %v3659_v37, %v2592_v41  ;;  %v2697_v55 = vsub.f32 1.0, %v3659_v37  ;;  %v2693_v27 = vmul.f32 %v3659_v37, %v4842_v8 }
0x15bf   :  { %v2606_v14 = vpack.c.bf16 %v2604_v62, %v2603_v26 }
0x15c0   :  { %v2605_v48 = vpack.c.bf16 %v2602_v28, %v2601_v40 }
0x15c1   :  { %2611 = vrot.lane.b32.xlu1 %v2606_v14, %s3725_s27 }
0x15c2   :  { %2609 = vrot.lane.b32.xlu0 %v2605_v48, %s3725_s27 }
0x1633   :  { %v2612_v31 = vpop.permute.xlu1 %2611 }
0x1634   :  { %v2610_v54 = vpop.permute.xlu0 %2609 }
0x1635   :  { %3454 = vmatprep.mubr.msk.bf16.mxu0 %vm41_vm2, %v2610_v54 }
0x1636   :  { %3455 = vmatmul.mubr.msk.bf16.vlgmr.msra.gmra.mrb[60].mxu0 %vm41_vm2, %v2612_v31 }
0x1637   :  { %3467 = vmatpush3.bf16.msra.mxu0 %v4750_v16 }
0x1638   :  { %3468 = vmatprep.subr.bf16.mxu0 %v4756_v33 }
0x163b   :  { %3469 = vmatpush3.bf16.msra.mxu0 %v4756_v33 }
0x1709   :  { %v3456_v47 = vpop.f32.mrb[60].mxu0 }
0x170a   :  { %v2653_v25 = vpop.f32.mrb[61].mxu0 }
0x170b   :  { %2672 = vrot.lane.b32.xlu0 %v2653_v25, %s3726_s28  ;;  %v3457_v5 = vpop.f32.mrb[62].mxu0 }
0x170c   :  { %v2656_v43 = vpop.f32.mrb[63].mxu0 }
0x170d   :  { %2674 = vrot.lane.b32.xlu1 %v2656_v43, %s3726_s28 }
0x170f   :  { %2676 = vrot.lane.b32.xlu0 %v3456_v47, %s3726_s28 }
0x1711   :  { %2678 = vrot.lane.b32.xlu1 %v3457_v5, %s3726_s28 }
0x177d   :  { %v2673_v15 = vpop.permute.xlu0 %2672 }
0x177e   :  { %v2684_v46 = vadd.f32 %v2673_v15, %v4406_v53 }
0x177f   :  { %v2675_v16 = vpop.permute.xlu1 %2674 }
0x1780   :  { %3660 = vtanh.f32 %v2684_v46  ;;  %v2685_v35 = vadd.f32 %v2675_v16, %v4413_v29  ;;  %v2696_v29 = vsub.f32 1.0, %v3655_v7 }
0x1781   :  { %v2677_v33 = vpop.permute.xlu0 %2676 }
0x1782   :  { %3662 = vtanh.f32 %v2685_v35  ;;  %v2686_v45 = vadd.f32 %v2677_v33, %v4470_v20  ;;  %v2692_v20 = vmul.f32 %v3655_v7, %v4838_v9  ;;  %v2699_v9 = vsub.f32 1.0, %v4878_v36 }
0x1783   :  { %v2679_v39 = vpop.permute.xlu1 %2678 }
0x1784   :  { %3664 = vtanh.f32 %v2686_v45  ;;  %v2687_v60 = vadd.f32 %v2679_v39, %v4476_v13 }
0x1786   :  { %3666 = vtanh.f32 %v2687_v60 }
0x178a   :  { %v3661_v0 = vpop.eup %3660 }
0x178b   :  { %2704 = vrot.lane.b32.xlu0 %v3661_v0, %s3726_s28 }
0x178c   :  { %v3663_v3 = vpop.eup %3662 }
0x178d   :  { %2706 = vrot.lane.b32.xlu1 %v3663_v3, %s3726_s28 }
0x178e   :  { %v3665_v53 = vpop.eup %3664 }
0x178f   :  { %2708 = vrot.lane.b32.xlu0 %v3665_v53, %s3726_s28 }
0x1790   :  { %v3667_v2 = vpop.eup %3666 }
0x1791   :  { %2710 = vrot.lane.b32.xlu1 %v3667_v2, %s3726_s28 }
0x17fd   :  { %v2705_v56 = vpop.permute.xlu0 %2704 }
0x17fe   :  { %v2716_v58 = vmul.f32 %v2705_v56, %v2696_v29 }
0x17ff   :  { %v2707_v13 = vpop.permute.xlu1 %2706 }
0x1800   :  { %v4902_v32 = vadd.f32 %v2716_v58, %v2692_v20  ;;  %v2717_v57 = vmul.f32 %v2707_v13, %v2697_v55 }
0x1801   :  { %v2709_v23 = vpop.permute.xlu0 %2708 }
0x1802   :  { %v4906_v50 = vadd.f32 %v2717_v57, %v2693_v27  ;;  %v2718_v4 = vmul.f32 %v2709_v23, %v2698_v18  ;;  %2813 = vrot.lane.b32.xlu0 %v4902_v32, %s3723_s4 }
0x1803   :  { %v2711_v19 = vpop.permute.xlu1 %2710 }
0x1804   :  { %v2724_v24 = vpack.c.bf16 %v4906_v50, %v4902_v32  ;;  %v4915_v8 = vadd.f32 %v2718_v4, %v2694_v22  ;;  %v2719_v59 = vmul.f32 %v2711_v19, %v2699_v9  ;;  %2815 = vrot.lane.b32.xlu1 %v4906_v50, %s3723_s4  ;;  %v3498_v22 = vld [vmem:[%s5000_s8] sm:$0xff]  }
0x1805   :  { %3474 = vmatprep.subr.bf16.mxu1 %v3498_v22 }
0x1806   :  { %v4921_v42 = vadd.f32 %v2719_v59, %v2695_v12  ;;  %2817 = vrot.lane.b32.xlu0 %v4915_v8, %s3723_s4  ;;  %3462 = vmatprep.mubr.msk.bf16.mxu1 %vm41_vm2, %v2724_v24 }
0x1808   :  { %v2725_v49 = vpack.c.bf16 %v4921_v42, %v4915_v8  ;;  %2819 = vrot.lane.b32.xlu1 %v4921_v42, %s3723_s4  ;;  %s3697_s4 = scalar_lea.vmem %s3045_s21, 512 }
0x1809   :  { %p3698_p0 = scmp.ne.s32.totalorder %s3045_s21, %s3697_s4  ;;  %p3703_p2 = scmp.lt.s32.totalorder %s3697_s4, %s3697_s4 }
0x180a   :  { %3463 = vmatmul.mubr.msk.bf16.vlgmr.msra.gmra.mrb[60].mxu1 %vm41_vm2, %v2725_v49 }
0x180b   :  { %3475 = vmatpush3.bf16.msra.mxu1 %v3498_v22  ;;  %p3704_p3 = por %p3703_p2, %p3702_p1 }
0x180d   :  { %p3705_p4 = pnand %p3704_p3, %p3698_p0 }
0x1874   :  { %v2814_v54 = vpop.permute.xlu0 %2813 }
0x1876   :  { %v2816_v31 = vpop.permute.xlu1 %2815 }
0x1878   :  { %v2818_v43 = vpop.permute.xlu0 %2817 }
0x187a   :  { %v2820_v15 = vpop.permute.xlu1 %2819 }
0x18dd   :  { %v3464_v21 = vpop.f32.mrb[60].mxu1 }
0x18de   :  { %v2783_v52 = vadd.f32 %v3464_v21, %v4467_v1  ;;  %v2766_v11 = vpop.f32.mrb[61].mxu1 }
0x18df   :  { %v2781_v51 = vadd.f32 %v2766_v11, %v4393_v63  ;;  %v3465_v30 = vpop.f32.mrb[62].mxu1 }
0x18e0   :  { %v3156_v38 = vmul.f32 -1.442695, %v2783_v52  ;;  %v2784_v34 = vadd.f32 %v3465_v30, %v4473_v61  ;;  %v2769_v41 = vpop.f32.mrb[63].mxu1 }
0x18e1   :  { %v3154_v17 = vmul.f32 -1.442695, %v2781_v51  ;;  %v2782_v7 = vadd.f32 %v2769_v41, %v4409_v10 }
0x18e2   :  { %3668 = vpow2.f32 %v3156_v38  ;;  %v3157_v36 = vmul.f32 -1.442695, %v2784_v34 }
0x18e3   :  { %3670 = vpow2.f32 %v3154_v17  ;;  %v3155_v44 = vmul.f32 -1.442695, %v2782_v7 }
0x18e4   :  { %3672 = vpow2.f32 %v3157_v36 }
0x18e5   :  { %3674 = vpow2.f32 %v3155_v44 }
0x18ec   :  { %v3669_v6 = vpop.eup %3668 }
0x18ed   :  { %v3671_v37 = vpop.eup %3670  ;;  %v2799_v26 = vadd.f32 1.0, %v3669_v6 }
0x18ee   :  { %v3673_v62 = vpop.eup %3672  ;;  %v2797_v40 = vadd.f32 1.0, %v3671_v37  ;;  %v3160_v37 = vld [vmem:[%s5001_s9] ss:$0 sm:$0xff] }
0x18ef   :  { %v3675_v28 = vpop.eup %3674  ;;  %3676 = vrcp.f32 %v2799_v26  ;;  %v2800_v14 = vadd.f32 1.0, %v3673_v62 }
0x18f0   :  { %3678 = vrcp.f32 %v2797_v40  ;;  %v2798_v48 = vadd.f32 1.0, %v3675_v28 }
0x18f1   :  { %3680 = vrcp.f32 %v2800_v14 }
0x18f2   :  { %3682 = vrcp.f32 %v2798_v48 }
0x18f9   :  { %v4935_v47 = vpop.eup %3676 }
0x18fa   :  { %v3679_v25 = vpop.eup %3678  ;;  %v2827_v16 = vmul.f32 %v4935_v47, %v2818_v43  ;;  %v2922_v51 = vsub.f32 1.0, %v4935_v47  ;;  %v2918_v34 = vmul.f32 %v4935_v47, %v4915_v8 }
0x18fb   :  { %v4937_v5 = vpop.eup %3680  ;;  %v2825_v33 = vmul.f32 %v3679_v25, %v2814_v54  ;;  %v2920_v9 = vsub.f32 1.0, %v3679_v25  ;;  %v2916_v24 = vmul.f32 %v3679_v25, %v4902_v32 }
0x18fc   :  { %v3683_v46 = vpop.eup %3682  ;;  %v2828_v35 = vmul.f32 %v4937_v5, %v2820_v15  ;;  %v2923_v17 = vsub.f32 1.0, %v4937_v5 }
0x18fd   :  { %v2826_v45 = vmul.f32 %v3683_v46, %v2816_v31  ;;  %v2921_v59 = vsub.f32 1.0, %v3683_v46  ;;  %v2917_v52 = vmul.f32 %v3683_v46, %v4906_v50  ;;  %v2919_v50 = vmul.f32 %v4937_v5, %v4921_v42 }
0x18fe   :  { %v2830_v39 = vpack.c.bf16 %v2828_v35, %v2827_v16 }
0x18ff   :  { %v2829_v60 = vpack.c.bf16 %v2826_v45, %v2825_v33 }
0x1900   :  { %2835 = vrot.lane.b32.xlu1 %v2830_v39, %s3725_s27 }
0x1901   :  { %2833 = vrot.lane.b32.xlu0 %v2829_v60, %s3725_s27 }
0x1972   :  { %v2836_v3 = vpop.permute.xlu1 %2835 }
0x1973   :  { %v2834_v0 = vpop.permute.xlu0 %2833 }
0x1974   :  { %3470 = vmatprep.mubr.msk.bf16.mxu0 %vm41_vm2, %v2834_v0 }
0x1975   :  { %3471 = vmatmul.mubr.msk.bf16.vlgmr.msra.gmra.mrb[64].mxu0 %vm41_vm2, %v2836_v3 }
0x1a48   :  { %v3472_v53 = vpop.f32.mrb[64].mxu0 }
0x1a49   :  { %v2877_v2 = vpop.f32.mrb[65].mxu0 }
0x1a4a   :  { %2896 = vrot.lane.b32.xlu0 %v2877_v2, %s3726_s28  ;;  %v3473_v29 = vpop.f32.mrb[66].mxu0 }
0x1a4b   :  { %v2880_v56 = vpop.f32.mrb[67].mxu0 }
0x1a4c   :  { %2898 = vrot.lane.b32.xlu1 %v2880_v56, %s3726_s28 }
0x1a4e   :  { %2900 = vrot.lane.b32.xlu0 %v3472_v53, %s3726_s28 }
0x1a50   :  { %2902 = vrot.lane.b32.xlu1 %v3473_v29, %s3726_s28 }
0x1abc   :  { %v2897_v20 = vpop.permute.xlu0 %2896 }
0x1abd   :  { %v2908_v58 = vadd.f32 %v2897_v20, %v4393_v63  ;;  %v3499_v63 = vld [vmem:[%s5000_s8 + $0x8] sm:$0xff]  }
0x1abe   :  { %v2899_v55 = vpop.permute.xlu1 %2898  ;;  %3476 = vmatprep.subr.bf16.mxu1 %v3499_v63 }
0x1abf   :  { %3684 = vtanh.f32 %v2908_v58  ;;  %v2909_v13 = vadd.f32 %v2899_v55, %v4409_v10  ;;  %3477 = vmatpush3.bf16.msra.mxu1 %v3499_v63 }
0x1ac0   :  { %v2901_v27 = vpop.permute.xlu0 %2900 }
0x1ac1   :  { %3686 = vtanh.f32 %v2909_v13  ;;  %v2910_v57 = vadd.f32 %v2901_v27, %v4467_v1 }
0x1ac2   :  { %v2903_v18 = vpop.permute.xlu1 %2902 }
0x1ac3   :  { %3688 = vtanh.f32 %v2910_v57  ;;  %v2911_v23 = vadd.f32 %v2903_v18, %v4473_v61 }
0x1ac5   :  { %3690 = vtanh.f32 %v2911_v23 }
0x1ac9   :  { %v3685_v10 = vpop.eup %3684 }
0x1aca   :  { %2928 = vrot.lane.b32.xlu0 %v3685_v10, %s3726_s28 }
0x1acb   :  { %v3687_v1 = vpop.eup %3686 }
0x1acc   :  { %2930 = vrot.lane.b32.xlu1 %v3687_v1, %s3726_s28 }
0x1acd   :  { %v3689_v61 = vpop.eup %3688 }
0x1ace   :  { %2932 = vrot.lane.b32.xlu0 %v3689_v61, %s3726_s28 }
0x1acf   :  { %v3691_v4 = vpop.eup %3690 }
0x1ad0   :  { %2934 = vrot.lane.b32.xlu1 %v3691_v4, %s3726_s28 }
0x1b3c   :  { %v2929_v19 = vpop.permute.xlu0 %2928 }
0x1b3d   :  { %v2940_v12 = vmul.f32 %v2929_v19, %v2920_v9 }
0x1b3e   :  { %v2931_v49 = vpop.permute.xlu1 %2930 }
0x1b3f   :  { %v2944_v21 = vadd.f32 %v2940_v12, %v2916_v24  ;;  %v2941_v11 = vmul.f32 %v2931_v49, %v2921_v59 }
0x1b40   :  { %v2933_v30 = vpop.permute.xlu0 %2932 }
0x1b41   :  { %2948 = vst.msk [vmem:[#allocation2] sm:$0xff] %vm41_vm2, %v2944_v21  ;;  %v2945_v38 = vadd.f32 %v2941_v11, %v2917_v52  ;;  %v2942_v41 = vmul.f32 %v2933_v30, %v2922_v51 }
0x1b42   :  { %v2935_v32 = vpop.permute.xlu1 %2934 }
0x1b43   :  { %2949 = vst.msk [vmem:[#allocation2 + $0x8] sm:$0xff] %vm41_vm2, %v2945_v38  ;;  %v2955_v7 = vpack.c.bf16 %v2945_v38, %v2944_v21  ;;  %v2946_v36 = vadd.f32 %v2942_v41, %v2918_v34  ;;  %v2943_v44 = vmul.f32 %v2935_v32, %v2923_v17 }
0x1b45   :  { %2950 = vst.msk [vmem:[#allocation2 + $0x10] sm:$0xff] %vm41_vm2, %v2946_v36  ;;  %v2947_v6 = vadd.f32 %v2943_v44, %v2919_v50  ;;  %3478 = vmatprep.mubr.msk.bf16.mxu1 %vm41_vm2, %v2955_v7 }
0x1b47   :  { %2951 = vst.msk [vmem:[#allocation2 + $0x18] sm:$0xff] %vm41_vm2, %v2947_v6  ;;  %v2956_v8 = vpack.c.bf16 %v2947_v6, %v2946_v36 }
0x1b49   :  { %3479 = vmatmul.mubr.msk.bf16.vlgmr.msra.gmra.mrb[64].mxu1 %vm41_vm2, %v2956_v8 }
0x1c1c   :  { %v3480_v26 = vpop.f32.mrb[64].mxu1 }
0x1c1d   :  { %v3029_v62 = vadd.f32 %v3480_v26, %v3160_v37  ;;  %v3020_v40 = vpop.f32.mrb[65].mxu1 }
0x1c1e   :  { %v3021_v42 = vadd.f32 %v3160_v37, %v3020_v40  ;;  %v3481_v28 = vpop.f32.mrb[66].mxu1 }
0x1c1f   :  { %3037 = vst [vmem:[#allocation3 + $0x10] sm:$0xff] %v3029_v62  ;;  %v3032_v14 = vadd.f32 %v3481_v28, %v3160_v37  ;;  %v3023_v48 = vpop.f32.mrb[67].mxu1 }
0x1c20   :  { %3035 = vst [vmem:[#allocation3] sm:$0xff] %v3021_v42  ;;  %v3024_v54 = vadd.f32 %v3160_v37, %v3023_v48 }
0x1c21   :  { %3038 = vst [vmem:[#allocation3 + $0x18] sm:$0xff] %v3032_v14 }
0x1c22   :  { %3036 = vst [vmem:[#allocation3 + $0x8] sm:$0xff] %v3024_v54 }
0x1c23   :  { %3708 = shalt.err (!%p3705_p4)
}
0x1c24   :  { %s3709_s23 = scalar_lea.hbm %s5002_s10, 512 }
0x1c25   :  { %p3710_p5 = scmp.ne.s32.totalorder %s5002_s10, %s3709_s23  ;;  %p3713_p6 = scmp.lt.u32.totalorder %s3709_s23, %s5002_s10 }
0x1c27   :  { %p3715_p7 = pnand %p3713_p6, %p3710_p5 }
0x1c29   :  { %3718 = shalt.err (!%p3715_p7)
}
0x1c2a   :  { %s3728_s25 = smov 128   ;;  %s3729_s26 = smov 8  }
0x1c2b   :  { %3050 = dma.vmem_to_hbm [thread:$0]  %s3045_s21, 512, %s5002_s10, [#allocation4], %s3728_s25, %s3728_s25, %s3729_s26  }
0x1c2c   :  { %3719 = dma.done.wait [#allocation4], 512  }
0x1c2d   :  { %3720 = vsyncadd [#allocation4], 4294966784 }
0x1c2e   :  { %3054 = vsyncpa [#allocation4], 1 }

</bundles_post_ra>
